<compile_context>
chip_gen: v7x
topology: tpu7x:2x2x1
jax: 0.10.0
libtpu: 0.0.40
codegen_flags: <defaults>
</compile_context>

<pallas_src>
import functools

import jax
import jax.numpy as jnp
from jax.experimental import pallas as pl
from jax.experimental.pallas import tpu as pltpu

_LANE = 128


def _round_up(n, m):
    return ((n + m - 1) // m) * m


def _vae_mlp_kernel(
    x_ref, eps_ref,
    w1_ref, b1_ref,
    w2_ref, b2_ref,
    w3_ref, b3_ref,      # fused fc31|fc32, padded to 128 output lanes
    w4_ref, b4_ref,
    w5_ref, b5_ref,
    w6_ref, b6_ref,
    recon_ref, mulv_ref,
    *, z_dim,
):
    bf16 = jnp.bfloat16
    x = x_ref[...]  # (TB, x_pad) bf16

    # ---------------- encoder ----------------
    h1 = jnp.dot(x, w1_ref[...], preferred_element_type=jnp.float32) + b1_ref[...]
    h1 = jnp.maximum(h1, 0.0)

    h2 = jnp.dot(h1.astype(bf16), w2_ref[...],
                 preferred_element_type=jnp.float32) + b2_ref[...]
    h2 = jnp.maximum(h2, 0.0)

    # fused fc31 | fc32 -> (TB, 128): lanes [0:z) = mu, [z:2z) = log_var, rest 0
    mulv = jnp.dot(h2.astype(bf16), w3_ref[...],
                   preferred_element_type=jnp.float32) + b3_ref[...]
    mu = mulv[:, :z_dim]
    log_var = mulv[:, z_dim:2 * z_dim]

    # ---------------- sampling (reparameterization) ----------------
    std = jnp.exp(0.5 * log_var)
    z = eps_ref[:, :z_dim] * std + mu

    # ---------------- decoder (no sigmoid, per module spec) ----------------
    h4 = jnp.dot(z.astype(bf16), w4_ref[...],
                 preferred_element_type=jnp.float32) + b4_ref[...]
    h4 = jnp.maximum(h4, 0.0)

    h5 = jnp.dot(h4.astype(bf16), w5_ref[...],
                 preferred_element_type=jnp.float32) + b5_ref[...]
    h5 = jnp.maximum(h5, 0.0)

    recon = jnp.dot(h5.astype(bf16), w6_ref[...],
                    preferred_element_type=jnp.float32) + b6_ref[...]

    recon_ref[...] = recon.astype(recon_ref.dtype)   # bf16 store (lane-dense)
    mulv_ref[...] = mulv                              # f32, 128-lane dense


def init_vae_params(key, x_dim, h_dim1, h_dim2, z_dim, dtype=jnp.float32):
    """Deterministic nn.Linear-style init: U(-1/sqrt(fan_in), 1/sqrt(fan_in)).

    Weights are stored as (in_features, out_features)."""
    dims = [
        ("fc1", x_dim, h_dim1),
        ("fc2", h_dim1, h_dim2),
        ("fc31", h_dim2, z_dim),
        ("fc32", h_dim2, z_dim),
        ("fc4", z_dim, h_dim2),
        ("fc5", h_dim2, h_dim1),
        ("fc6", h_dim1, x_dim),
    ]
    params = {}
    keys = jax.random.split(key, 2 * len(dims))
    for i, (name, fan_in, fan_out) in enumerate(dims):
        bound = 1.0 / jnp.sqrt(jnp.asarray(fan_in, jnp.float32))
        w = jax.random.uniform(keys[2 * i], (fan_in, fan_out), dtype,
                               minval=-bound, maxval=bound)
        b = jax.random.uniform(keys[2 * i + 1], (1, fan_out), dtype,
                               minval=-bound, maxval=bound)
        params[name] = (w, b)
    return params


@functools.partial(jax.jit, static_argnames=("x_dim",))
def vae_mlp_forward(x_img, params, eps, *, x_dim=784):
    """Full VAE_mlp forward. Returns (recon, x_img, mu, log_var)."""
    total = x_img.size
    assert total % x_dim == 0, "input size not divisible by x_dim"
    batch = total // x_dim

    z_dim = params["fc31"][0].shape[1]
    zp = max(_round_up(2 * z_dim, _LANE), _LANE)   # lane-dense mu|logvar slab

    # ---- lane-dense padding of the 784 image dim (784 -> 896 = 7*128) ----
    x_pad = _round_up(x_dim, _LANE)
    pad_cols = x_pad - x_dim

    # ---- batch tile: >=2 grid steps for v7x megacore, multiples of 128 ----
    if batch >= 256:
        half = -(-batch // 2)                       # ceil(batch / 2)
        tb = min(1024, _round_up(half, _LANE))
    elif batch >= 128:
        tb = 128
    else:
        tb = _round_up(max(batch, 1), 16)           # bf16 sublane packing
    batch_pad = _round_up(batch, tb)
    grid = (batch_pad // tb,)

    bf16 = jnp.bfloat16

    # cast to bf16 BEFORE padding (halves the wrapper-side intermediate write)
    x = x_img.reshape(batch, x_dim).astype(bf16)    # x.view(-1, 784)
    x = jnp.pad(x, ((0, batch_pad - batch), (0, pad_cols)))
    eps_p = jnp.pad(eps.astype(jnp.float32),
                    ((0, batch_pad - batch), (0, zp - z_dim)))

    w1, b1 = params["fc1"]
    w2, b2 = params["fc2"]
    w31, b31 = params["fc31"]
    w32, b32 = params["fc32"]
    w4, b4 = params["fc4"]
    w5, b5 = params["fc5"]
    w6, b6 = params["fc6"]

    # pad fc1 input rows / fc6 output cols with zeros; fuse + pad fc31|fc32
    w1p = jnp.pad(w1, ((0, pad_cols), (0, 0))).astype(bf16)
    w6p = jnp.pad(w6, ((0, 0), (0, pad_cols))).astype(bf16)
    b6p = jnp.pad(b6.astype(jnp.float32), ((0, 0), (0, pad_cols)))
    w3 = jnp.pad(jnp.concatenate([w31, w32], axis=1),
                 ((0, 0), (0, zp - 2 * z_dim))).astype(bf16)
    b3 = jnp.pad(jnp.concatenate([b31, b32], axis=1).astype(jnp.float32),
                 ((0, 0), (0, zp - 2 * z_dim)))

    weights = [
        w1p, b1.astype(jnp.float32),
        w2.astype(bf16), b2.astype(jnp.float32),
        w3, b3,
        w4.astype(bf16), b4.astype(jnp.float32),
        w5.astype(bf16), b5.astype(jnp.float32),
        w6p, b6p,
    ]

    def resident(a):  # full-extent block, constant index map -> stays in VMEM
        return pl.BlockSpec(a.shape, lambda i: (0, 0))

    in_specs = (
        [pl.BlockSpec((tb, x_pad), lambda i: (i, 0)),
         pl.BlockSpec((tb, zp), lambda i: (i, 0))]
        + [resident(a) for a in weights]
    )
    out_specs = (
        pl.BlockSpec((tb, x_pad), lambda i: (i, 0)),
        pl.BlockSpec((tb, zp), lambda i: (i, 0)),
    )

    # VMEM budget: scales with tile; capped well under v7x's 64 MiB physical.
    vmem_limit = 48 * 1024 * 1024 if tb >= 512 else 32 * 1024 * 1024

    recon_p, mulv = pl.pallas_call(
        functools.partial(_vae_mlp_kernel, z_dim=z_dim),
        out_shape=(
            jax.ShapeDtypeStruct((batch_pad, x_pad), bf16),        # bf16 recon
            jax.ShapeDtypeStruct((batch_pad, zp), jnp.float32),    # mu|logvar
        ),
        grid_spec=pltpu.PrefetchScalarGridSpec(
            num_scalar_prefetch=0,
            grid=grid,
            in_specs=in_specs,
            out_specs=out_specs,
        ),
        compiler_params=pltpu.CompilerParams(
            dimension_semantics=("parallel",),
            vmem_limit_bytes=vmem_limit,
        ),
    )(x, eps_p, *weights)

    recon = recon_p[:batch, :x_dim].astype(jnp.float32)
    mu = mulv[:batch, :z_dim]
    log_var = mulv[:batch, z_dim:2 * z_dim]
    return recon, x_img, mu, log_var


def _reference_forward(x_img, params, eps, x_dim=784):
    """Pure-JAX reference with the same bf16-operand / f32-accum matmuls."""
    x = x_img.reshape(-1, x_dim).astype(jnp.float32)
    bf16 = jnp.bfloat16

    def lin(name, h):
        w, b = params[name]
        return jnp.dot(h.astype(bf16), w.astype(bf16),
                       preferred_element_type=jnp.float32) + b

    h = jax.nn.relu(lin("fc1", x))
    h = jax.nn.relu(lin("fc2", h))
    mu = lin("fc31", h)
    log_var = lin("fc32", h)
    z = eps * jnp.exp(0.5 * log_var) + mu
    h = jax.nn.relu(lin("fc4", z))
    h = jax.nn.relu(lin("fc5", h))
    recon = lin("fc6", h)
    return recon, mu, log_var


if __name__ == "__main__":
    # Sizes implied by the module: x_dim=784 (x.view(-1, 784)); small hidden dims.
    X_DIM, H1, H2, Z_DIM = 784, 256, 128, 32
    BATCH = 8

    key = jax.random.PRNGKey(0)
    k_x, k_p, k_eps = jax.random.split(key, 3)

    x_img = jax.random.normal(k_x, (BATCH, 1, 28, 28), jnp.float32)  # NCHW
    params = init_vae_params(k_p, X_DIM, H1, H2, Z_DIM)
    eps = jax.random.normal(k_eps, (BATCH, Z_DIM), jnp.float32)  # torch.randn_like(std)

    recon, x_out, mu, log_var = vae_mlp_forward(x_img, params, eps, x_dim=X_DIM)
    jax.block_until_ready((recon, x_out, mu, log_var))

    # Correctness check against a bf16-matched pure-JAX reference.
    r_ref, mu_ref, lv_ref = _reference_forward(x_img, params, eps, X_DIM)
    assert recon.shape == (BATCH, X_DIM)
    assert mu.shape == (BATCH, Z_DIM) and log_var.shape == (BATCH, Z_DIM)
    assert x_out.shape == x_img.shape
    # recon is stored in bf16 by the kernel -> slightly looser tolerance.
    assert jnp.allclose(recon, r_ref, atol=2e-2, rtol=2e-2)
    assert jnp.allclose(mu, mu_ref, atol=1e-2, rtol=1e-2)
    assert jnp.allclose(log_var, lv_ref, atol=1e-2, rtol=1e-2)

    print("KERNEL_OK")
</pallas_src>

<mosaic_0001>
module attributes {stable_mosaic.version = 11 : i64} {
  func.func @_vae_mlp_kernel(%arg0: i32, %arg1: memref<16x896xbf16, #tpu.memory_space<vmem>>, %arg2: memref<16x128xf32, #tpu.memory_space<vmem>>, %arg3: memref<896x256xbf16, #tpu.memory_space<vmem>>, %arg4: memref<1x256xf32, #tpu.memory_space<vmem>>, %arg5: memref<256x128xbf16, #tpu.memory_space<vmem>>, %arg6: memref<1x128xf32, #tpu.memory_space<vmem>>, %arg7: memref<128x128xbf16, #tpu.memory_space<vmem>>, %arg8: memref<1x128xf32, #tpu.memory_space<vmem>>, %arg9: memref<32x128xbf16, #tpu.memory_space<vmem>>, %arg10: memref<1x128xf32, #tpu.memory_space<vmem>>, %arg11: memref<128x256xbf16, #tpu.memory_space<vmem>>, %arg12: memref<1x256xf32, #tpu.memory_space<vmem>>, %arg13: memref<256x896xbf16, #tpu.memory_space<vmem>>, %arg14: memref<1x896xf32, #tpu.memory_space<vmem>>, %arg15: memref<16x896xbf16, #tpu.memory_space<vmem>>, %arg16: memref<16x128xf32, #tpu.memory_space<vmem>>) attributes {dimension_semantics = [#tpu.dimension_semantics<parallel>], iteration_bounds = array<i64: 1>, scalar_prefetch = 0 : i64, scratch_operands = 0 : i64, tpu.core_type = #tpu.core_type<tc>, window_params = [{transform_indices = @transform_0, window_bounds = array<i64: 16, 896>}, {transform_indices = @transform_1, window_bounds = array<i64: 16, 128>}, {pipeline_mode = #tpu.pipeline_mode<synchronous>, transform_indices = @transform_2, window_bounds = array<i64: 896, 256>}, {pipeline_mode = #tpu.pipeline_mode<synchronous>, transform_indices = @transform_3, window_bounds = array<i64: 1, 256>}, {pipeline_mode = #tpu.pipeline_mode<synchronous>, transform_indices = @transform_4, window_bounds = array<i64: 256, 128>}, {pipeline_mode = #tpu.pipeline_mode<synchronous>, transform_indices = @transform_5, window_bounds = array<i64: 1, 128>}, {pipeline_mode = #tpu.pipeline_mode<synchronous>, transform_indices = @transform_6, window_bounds = array<i64: 128, 128>}, {pipeline_mode = #tpu.pipeline_mode<synchronous>, transform_indices = @transform_7, window_bounds = array<i64: 1, 128>}, {pipeline_mode = #tpu.pipeline_mode<synchronous>, transform_indices = @transform_8, window_bounds = array<i64: 32, 128>}, {pipeline_mode = #tpu.pipeline_mode<synchronous>, transform_indices = @transform_9, window_bounds = array<i64: 1, 128>}, {pipeline_mode = #tpu.pipeline_mode<synchronous>, transform_indices = @transform_10, window_bounds = array<i64: 128, 256>}, {pipeline_mode = #tpu.pipeline_mode<synchronous>, transform_indices = @transform_11, window_bounds = array<i64: 1, 256>}, {pipeline_mode = #tpu.pipeline_mode<synchronous>, transform_indices = @transform_12, window_bounds = array<i64: 256, 896>}, {pipeline_mode = #tpu.pipeline_mode<synchronous>, transform_indices = @transform_13, window_bounds = array<i64: 1, 896>}, {transform_indices = @transform_14, window_bounds = array<i64: 16, 896>}, {transform_indices = @transform_15, window_bounds = array<i64: 16, 128>}]} {
    %c0 = arith.constant 0 : index
    %c0_0 = arith.constant 0 : index
    %0 = vector.load %arg1[%c0, %c0_0] : memref<16x896xbf16, #tpu.memory_space<vmem>>, vector<16x896xbf16>
    %c0_1 = arith.constant 0 : index
    %c0_2 = arith.constant 0 : index
    %1 = vector.load %arg3[%c0_1, %c0_2] : memref<896x256xbf16, #tpu.memory_space<vmem>>, vector<896x256xbf16>
    %cst = arith.constant dense<0.000000e+00> : vector<16x256xf32>
    %2 = tpu.matmul %0, %1, %cst {dimension_numbers = #tpu.dot_dimension_numbers<[1], [0], [0], [1], [0, 0, 1, 1], [], []>} : vector<16x896xbf16>, vector<896x256xbf16>, vector<16x256xf32> -> vector<16x256xf32>
    %c0_3 = arith.constant 0 : index
    %c0_4 = arith.constant 0 : index
    %3 = vector.load %arg4[%c0_3, %c0_4] : memref<1x256xf32, #tpu.memory_space<vmem>>, vector<1x256xf32>
    %4 = vector.broadcast %3 : vector<1x256xf32> to vector<16x256xf32>
    %5 = arith.addf %2, %4 : vector<16x256xf32>
    %cst_5 = arith.constant 0.000000e+00 : f32
    %6 = vector.broadcast %cst_5 : f32 to vector<16x256xf32>
    %7 = arith.maximumf %5, %6 : vector<16x256xf32>
    %8 = arith.truncf %7 : vector<16x256xf32> to vector<16x256xbf16>
    %c0_6 = arith.constant 0 : index
    %c0_7 = arith.constant 0 : index
    %9 = vector.load %arg5[%c0_6, %c0_7] : memref<256x128xbf16, #tpu.memory_space<vmem>>, vector<256x128xbf16>
    %cst_8 = arith.constant dense<0.000000e+00> : vector<16x128xf32>
    %10 = tpu.matmul %8, %9, %cst_8 {dimension_numbers = #tpu.dot_dimension_numbers<[1], [0], [0], [1], [0, 0, 1, 1], [], []>} : vector<16x256xbf16>, vector<256x128xbf16>, vector<16x128xf32> -> vector<16x128xf32>
    %c0_9 = arith.constant 0 : index
    %c0_10 = arith.constant 0 : index
    %11 = vector.load %arg6[%c0_9, %c0_10] : memref<1x128xf32, #tpu.memory_space<vmem>>, vector<1x128xf32>
    %12 = vector.broadcast %11 : vector<1x128xf32> to vector<16x128xf32>
    %13 = arith.addf %10, %12 : vector<16x128xf32>
    %cst_11 = arith.constant 0.000000e+00 : f32
    %14 = vector.broadcast %cst_11 : f32 to vector<16x128xf32>
    %15 = arith.maximumf %13, %14 : vector<16x128xf32>
    %16 = arith.truncf %15 : vector<16x128xf32> to vector<16x128xbf16>
    %c0_12 = arith.constant 0 : index
    %c0_13 = arith.constant 0 : index
    %17 = vector.load %arg7[%c0_12, %c0_13] : memref<128x128xbf16, #tpu.memory_space<vmem>>, vector<128x128xbf16>
    %cst_14 = arith.constant dense<0.000000e+00> : vector<16x128xf32>
    %18 = tpu.matmul %16, %17, %cst_14 {dimension_numbers = #tpu.dot_dimension_numbers<[1], [0], [0], [1], [0, 0, 1, 1], [], []>} : vector<16x128xbf16>, vector<128x128xbf16>, vector<16x128xf32> -> vector<16x128xf32>
    %c0_15 = arith.constant 0 : index
    %c0_16 = arith.constant 0 : index
    %19 = vector.load %arg8[%c0_15, %c0_16] : memref<1x128xf32, #tpu.memory_space<vmem>>, vector<1x128xf32>
    %20 = vector.broadcast %19 : vector<1x128xf32> to vector<16x128xf32>
    %21 = arith.addf %18, %20 : vector<16x128xf32>
    %22 = vector.extract_strided_slice %21 {offsets = [0, 0], sizes = [16, 32], strides = [1, 1]} : vector<16x128xf32> to vector<16x32xf32>
    %23 = vector.extract_strided_slice %21 {offsets = [0, 32], sizes = [16, 32], strides = [1, 1]} : vector<16x128xf32> to vector<16x32xf32>
    %cst_17 = arith.constant 5.000000e-01 : f32
    %24 = vector.broadcast %cst_17 : f32 to vector<16x32xf32>
    %25 = arith.mulf %24, %23 : vector<16x32xf32>
    %26 = math.exp %25 : vector<16x32xf32>
    %c0_18 = arith.constant 0 : index
    %c0_19 = arith.constant 0 : index
    %27 = vector.load %arg2[%c0_18, %c0_19] : memref<16x128xf32, #tpu.memory_space<vmem>>, vector<16x32xf32>
    %28 = arith.mulf %27, %26 : vector<16x32xf32>
    %29 = arith.addf %28, %22 : vector<16x32xf32>
    %30 = arith.truncf %29 : vector<16x32xf32> to vector<16x32xbf16>
    %c0_20 = arith.constant 0 : index
    %c0_21 = arith.constant 0 : index
    %31 = vector.load %arg9[%c0_20, %c0_21] : memref<32x128xbf16, #tpu.memory_space<vmem>>, vector<32x128xbf16>
    %cst_22 = arith.constant dense<0.000000e+00> : vector<16x128xf32>
    %32 = tpu.matmul %30, %31, %cst_22 {dimension_numbers = #tpu.dot_dimension_numbers<[1], [0], [0], [1], [0, 0, 1, 1], [], []>} : vector<16x32xbf16>, vector<32x128xbf16>, vector<16x128xf32> -> vector<16x128xf32>
    %c0_23 = arith.constant 0 : index
    %c0_24 = arith.constant 0 : index
    %33 = vector.load %arg10[%c0_23, %c0_24] : memref<1x128xf32, #tpu.memory_space<vmem>>, vector<1x128xf32>
    %34 = vector.broadcast %33 : vector<1x128xf32> to vector<16x128xf32>
    %35 = arith.addf %32, %34 : vector<16x128xf32>
    %cst_25 = arith.constant 0.000000e+00 : f32
    %36 = vector.broadcast %cst_25 : f32 to vector<16x128xf32>
    %37 = arith.maximumf %35, %36 : vector<16x128xf32>
    %38 = arith.truncf %37 : vector<16x128xf32> to vector<16x128xbf16>
    %c0_26 = arith.constant 0 : index
    %c0_27 = arith.constant 0 : index
    %39 = vector.load %arg11[%c0_26, %c0_27] : memref<128x256xbf16, #tpu.memory_space<vmem>>, vector<128x256xbf16>
    %cst_28 = arith.constant dense<0.000000e+00> : vector<16x256xf32>
    %40 = tpu.matmul %38, %39, %cst_28 {dimension_numbers = #tpu.dot_dimension_numbers<[1], [0], [0], [1], [0, 0, 1, 1], [], []>} : vector<16x128xbf16>, vector<128x256xbf16>, vector<16x256xf32> -> vector<16x256xf32>
    %c0_29 = arith.constant 0 : index
    %c0_30 = arith.constant 0 : index
    %41 = vector.load %arg12[%c0_29, %c0_30] : memref<1x256xf32, #tpu.memory_space<vmem>>, vector<1x256xf32>
    %42 = vector.broadcast %41 : vector<1x256xf32> to vector<16x256xf32>
    %43 = arith.addf %40, %42 : vector<16x256xf32>
    %cst_31 = arith.constant 0.000000e+00 : f32
    %44 = vector.broadcast %cst_31 : f32 to vector<16x256xf32>
    %45 = arith.maximumf %43, %44 : vector<16x256xf32>
    %46 = arith.truncf %45 : vector<16x256xf32> to vector<16x256xbf16>
    %c0_32 = arith.constant 0 : index
    %c0_33 = arith.constant 0 : index
    %47 = vector.load %arg13[%c0_32, %c0_33] : memref<256x896xbf16, #tpu.memory_space<vmem>>, vector<256x896xbf16>
    %cst_34 = arith.constant dense<0.000000e+00> : vector<16x896xf32>
    %48 = tpu.matmul %46, %47, %cst_34 {dimension_numbers = #tpu.dot_dimension_numbers<[1], [0], [0], [1], [0, 0, 1, 1], [], []>} : vector<16x256xbf16>, vector<256x896xbf16>, vector<16x896xf32> -> vector<16x896xf32>
    %c0_35 = arith.constant 0 : index
    %c0_36 = arith.constant 0 : index
    %49 = vector.load %arg14[%c0_35, %c0_36] : memref<1x896xf32, #tpu.memory_space<vmem>>, vector<1x896xf32>
    %50 = vector.broadcast %49 : vector<1x896xf32> to vector<16x896xf32>
    %51 = arith.addf %48, %50 : vector<16x896xf32>
    %52 = arith.truncf %51 : vector<16x896xf32> to vector<16x896xbf16>
    %c0_37 = arith.constant 0 : index
    %c0_38 = arith.constant 0 : index
    %53 = vector.load %arg15[%c0_37, %c0_38] : memref<16x896xbf16, #tpu.memory_space<vmem>>, vector<16x896xbf16>
    tpu.vector_store %arg15[%c0_37, %c0_38], %52 {strides = array<i32>} : memref<16x896xbf16, #tpu.memory_space<vmem>>, vector<16x896xbf16>,
    %c0_39 = arith.constant 0 : index
    %c0_40 = arith.constant 0 : index
    %54 = vector.load %arg16[%c0_39, %c0_40] : memref<16x128xf32, #tpu.memory_space<vmem>>, vector<16x128xf32>
    tpu.vector_store %arg16[%c0_39, %c0_40], %21 {strides = array<i32>} : memref<16x128xf32, #tpu.memory_space<vmem>>, vector<16x128xf32>,
    return
  }
  func.func @transform_0(%arg0: i32) -> (i32, i32) {
    %c0_i32 = arith.constant 0 : i32
    %c0_i32_0 = arith.constant 0 : i32
    return %arg0, %c0_i32 : i32, i32
  }
  func.func @transform_1(%arg0: i32) -> (i32, i32) {
    %c0_i32 = arith.constant 0 : i32
    %c0_i32_0 = arith.constant 0 : i32
    return %arg0, %c0_i32 : i32, i32
  }
  func.func @transform_2(%arg0: i32) -> (i32, i32) {
    %c0_i32 = arith.constant 0 : i32
    %c0_i32_0 = arith.constant 0 : i32
    %c0_i32_1 = arith.constant 0 : i32
    return %c0_i32, %c0_i32_0 : i32, i32
  }
  func.func @transform_3(%arg0: i32) -> (i32, i32) {
    %c0_i32 = arith.constant 0 : i32
    %c0_i32_0 = arith.constant 0 : i32
    %c0_i32_1 = arith.constant 0 : i32
    return %c0_i32, %c0_i32_0 : i32, i32
  }
  func.func @transform_4(%arg0: i32) -> (i32, i32) {
    %c0_i32 = arith.constant 0 : i32
    %c0_i32_0 = arith.constant 0 : i32
    %c0_i32_1 = arith.constant 0 : i32
    return %c0_i32, %c0_i32_0 : i32, i32
  }
  func.func @transform_5(%arg0: i32) -> (i32, i32) {
    %c0_i32 = arith.constant 0 : i32
    %c0_i32_0 = arith.constant 0 : i32
    %c0_i32_1 = arith.constant 0 : i32
    return %c0_i32, %c0_i32_0 : i32, i32
  }
  func.func @transform_6(%arg0: i32) -> (i32, i32) {
    %c0_i32 = arith.constant 0 : i32
    %c0_i32_0 = arith.constant 0 : i32
    %c0_i32_1 = arith.constant 0 : i32
    return %c0_i32, %c0_i32_0 : i32, i32
  }
  func.func @transform_7(%arg0: i32) -> (i32, i32) {
    %c0_i32 = arith.constant 0 : i32
    %c0_i32_0 = arith.constant 0 : i32
    %c0_i32_1 = arith.constant 0 : i32
    return %c0_i32, %c0_i32_0 : i32, i32
  }
  func.func @transform_8(%arg0: i32) -> (i32, i32) {
    %c0_i32 = arith.constant 0 : i32
    %c0_i32_0 = arith.constant 0 : i32
    %c0_i32_1 = arith.constant 0 : i32
    return %c0_i32, %c0_i32_0 : i32, i32
  }
  func.func @transform_9(%arg0: i32) -> (i32, i32) {
    %c0_i32 = arith.constant 0 : i32
    %c0_i32_0 = arith.constant 0 : i32
    %c0_i32_1 = arith.constant 0 : i32
    return %c0_i32, %c0_i32_0 : i32, i32
  }
  func.func @transform_10(%arg0: i32) -> (i32, i32) {
    %c0_i32 = arith.constant 0 : i32
    %c0_i32_0 = arith.constant 0 : i32
    %c0_i32_1 = arith.constant 0 : i32
    return %c0_i32, %c0_i32_0 : i32, i32
  }
  func.func @transform_11(%arg0: i32) -> (i32, i32) {
    %c0_i32 = arith.constant 0 : i32
    %c0_i32_0 = arith.constant 0 : i32
    %c0_i32_1 = arith.constant 0 : i32
    return %c0_i32, %c0_i32_0 : i32, i32
  }
  func.func @transform_12(%arg0: i32) -> (i32, i32) {
    %c0_i32 = arith.constant 0 : i32
    %c0_i32_0 = arith.constant 0 : i32
    %c0_i32_1 = arith.constant 0 : i32
    return %c0_i32, %c0_i32_0 : i32, i32
  }
  func.func @transform_13(%arg0: i32) -> (i32, i32) {
    %c0_i32 = arith.constant 0 : i32
    %c0_i32_0 = arith.constant 0 : i32
    %c0_i32_1 = arith.constant 0 : i32
    return %c0_i32, %c0_i32_0 : i32, i32
  }
  func.func @transform_14(%arg0: i32) -> (i32, i32) {
    %c0_i32 = arith.constant 0 : i32
    %c0_i32_0 = arith.constant 0 : i32
    return %arg0, %c0_i32 : i32, i32
  }
  func.func @transform_15(%arg0: i32) -> (i32, i32) {
    %c0_i32 = arith.constant 0 : i32
    %c0_i32_0 = arith.constant 0 : i32
    return %arg0, %c0_i32 : i32, i32
  }
}

</mosaic_0001>

<bundles_post_ra>
// kernel: vae_mlp_forward.1
= control target key start
LH: loop header
LB: loop body
LE: loop exit
PB: predicated region body
PF: predicated region fallthrough
CT: control target
= control target key end

     0   :  { %vm3260_vm0 = vmmov 0   ;;  %vm1291_vm1 = vcmask 261120   ;;  %s4262_s2 = inlined_call_operand.vmem [shape: bf16[896,256], index: 2, kind: input, shape index: {}]   ;;  %s4263_s0 = inlined_call_operand.vmem [shape: bf16[16,896], index: 0, kind: input, shape index: {}]   ;;  %s4264_s4 = inlined_call_operand.vmem [shape: bf16[256,128], index: 4, kind: input, shape index: {}]   ;;  %s4265_s6 = inlined_call_operand.vmem [shape: bf16[128,128], index: 6, kind: input, shape index: {}]   ;;  %s4266_s3 = inlined_call_operand.vmem [shape: f32[1,256], index: 3, kind: input, shape index: {}]   ;;  %s4267_s5 = inlined_call_operand.vmem [shape: f32[1,128], index: 5, kind: input, shape index: {}]   ;;  %s4268_s7 = inlined_call_operand.vmem [shape: f32[1,128], index: 7, kind: input, shape index: {}]   ;;  %s4269_s15 = inlined_call_operand.vmem [shape: f32[16,128], index: 15, kind: output, shape index: {1}]   ;;  %s4270_s8 = inlined_call_operand.vmem [shape: bf16[32,128], index: 8, kind: input, shape index: {}]   ;;  %s4271_s10 = inlined_call_operand.vmem [shape: bf16[128,256], index: 10, kind: input, shape index: {}]   ;;  %s4272_s1 = inlined_call_operand.vmem [shape: f32[16,128], index: 1, kind: input, shape index: {}]   ;;  %s4273_s12 = inlined_call_operand.vmem [shape: bf16[256,896], index: 12, kind: input, shape index: {}]   ;;  %s4274_s9 = inlined_call_operand.vmem [shape: f32[1,128], index: 9, kind: input, shape index: {}]   ;;  %s4275_s11 = inlined_call_operand.vmem [shape: f32[1,256], index: 11, kind: input, shape index: {}]   ;;  %s4276_s13 = inlined_call_operand.vmem [shape: f32[1,896], index: 13, kind: input, shape index: {}]   ;;  %s4277_s14 = inlined_call_operand.vmem [shape: bf16[16,896], index: 14, kind: output, shape index: {0}]  }
   0x1   :  { %v2866_v0 = vld [vmem:[%s4262_s2 + $0x4] ss:$8 sps:$4 sm:$0xff]   ;;  %v2868_v1 = vld [vmem:[%s4262_s2] ss:$8 sps:$4 sm:$0xff]   ;;  %v2869_v2 = vld [vmem:[%s4262_s2 + $0x14] ss:$8 sps:$4 sm:$0xff]  }
   0x2   :  { %778 = vmatprep.subr.bf16.mxu0 %v2866_v0  ;;  %v2871_v3 = vld [vmem:[%s4262_s2 + $0x10] ss:$8 sps:$4 sm:$0xff]   ;;  %v2872_v4 = vld [vmem:[%s4262_s2 + $0x24] ss:$8 sps:$4 sm:$0xff]   ;;  %v2874_v5 = vld [vmem:[%s4262_s2 + $0x20] ss:$8 sps:$4 sm:$0xff]  }
   0x3   :  { %779 = vmatpush1.bf16.msra.mxu0 %v2868_v1  ;;  %v2875_v6 = vld [vmem:[%s4262_s2 + $0x34] ss:$8 sps:$4 sm:$0xff]   ;;  %v2877_v7 = vld [vmem:[%s4262_s2 + $0x30] ss:$8 sps:$4 sm:$0xff]   ;;  %v2878_v8 = vld [vmem:[%s4262_s2 + $0x44] ss:$8 sps:$4 sm:$0xff]  }
   0x4   :  { %780 = vmatprep.subr.bf16.mxu0 %v2869_v2  ;;  %v2880_v9 = vld [vmem:[%s4262_s2 + $0x40] ss:$8 sps:$4 sm:$0xff]   ;;  %v2881_v10 = vld [vmem:[%s4262_s2 + $0x54] ss:$8 sps:$4 sm:$0xff]   ;;  %v2883_v11 = vld [vmem:[%s4262_s2 + $0x50] ss:$8 sps:$4 sm:$0xff]  }
   0x5   :  { %v2884_v12 = vld [vmem:[%s4262_s2 + $0x64] ss:$8 sps:$4 sm:$0xff]   ;;  %v2886_v14 = vld [vmem:[%s4262_s2 + $0x60] ss:$8 sps:$4 sm:$0xff]   ;;  %v2887_v15 = vld [vmem:[%s4262_s2 + $0x74] ss:$8 sps:$4 sm:$0xff]  }
   0x6   :  { %v2916_v13 = vld [vmem:[%s4263_s0 + $0x4] ss:$28 sps:$4 sm:$0xff]   ;;  %v2889_v16 = vld [vmem:[%s4262_s2 + $0x70] ss:$8 sps:$4 sm:$0xff]   ;;  %v2893_v19 = vld [vmem:[%s4262_s2 + $0x94] ss:$8 sps:$4 sm:$0xff]  }
   0x7   :  { %781 = vmatpush1.bf16.msra.mxu0 %v2871_v3  ;;  %810 = vmatprep.mubr.bf16.mxu0 %v2916_v13  ;;  %v2890_v17 = vld [vmem:[%s4262_s2 + $0x84] ss:$8 sps:$4 sm:$0xff]   ;;  %v2892_v18 = vld [vmem:[%s4262_s2 + $0x80] ss:$8 sps:$4 sm:$0xff]   ;;  %v2895_v20 = vld [vmem:[%s4262_s2 + $0x90] ss:$8 sps:$4 sm:$0xff]  }
   0x8   :  { %782 = vmatprep.subr.bf16.mxu0 %v2872_v4  ;;  %v2896_v21 = vld [vmem:[%s4262_s2 + $0xa4] ss:$8 sps:$4 sm:$0xff]   ;;  %v2898_v22 = vld [vmem:[%s4262_s2 + $0xa0] ss:$8 sps:$4 sm:$0xff]   ;;  %v2899_v23 = vld [vmem:[%s4262_s2 + $0xb4] ss:$8 sps:$4 sm:$0xff]  }
   0x9   :  { %v2901_v24 = vld [vmem:[%s4262_s2 + $0xb0] ss:$8 sps:$4 sm:$0xff]   ;;  %v2902_v25 = vld [vmem:[%s4262_s2 + $0xc4] ss:$8 sps:$4 sm:$0xff]   ;;  %v2904_v26 = vld [vmem:[%s4262_s2 + $0xc0] ss:$8 sps:$4 sm:$0xff]  }
   0xa   :  { %v2905_v27 = vld [vmem:[%s4262_s2 + $0xd4] ss:$8 sps:$4 sm:$0xff]   ;;  %v2907_v28 = vld [vmem:[%s4262_s2 + $0xd0] ss:$8 sps:$4 sm:$0xff]   ;;  %v2908_v29 = vld [vmem:[%s4262_s2 + $0xe4] ss:$8 sps:$4 sm:$0xff]  }
   0xb   :  { %783 = vmatpush1.bf16.msra.mxu0 %v2874_v5  ;;  %v2910_v30 = vld [vmem:[%s4262_s2 + $0xe0] ss:$8 sps:$4 sm:$0xff]   ;;  %v2911_v31 = vld [vmem:[%s4262_s2 + $0xf4] ss:$8 sps:$4 sm:$0xff]   ;;  %v2913_v32 = vld [vmem:[%s4262_s2 + $0xf0] ss:$8 sps:$4 sm:$0xff]  }
   0xc   :  { %784 = vmatprep.subr.bf16.mxu0 %v2875_v6  ;;  %v2919_v33 = vld [vmem:[%s4262_s2 + $0x104] ss:$8 sps:$4 sm:$0xff]   ;;  %v2914_v34 = vld [vmem:[%s4263_s0] ss:$28 sps:$4 sm:$0xff]   ;;  %v2920_v38 = vld [vmem:[%s4262_s2 + $0x110] ss:$8 sps:$4 sm:$0xff]  }
   0xd   :  { %v2917_v35 = vld [vmem:[%s4262_s2 + $0x100] ss:$8 sps:$4 sm:$0xff]   ;;  %v2922_v37 = vld [vmem:[%s4262_s2 + $0x114] ss:$8 sps:$4 sm:$0xff]   ;;  %v2925_v39 = vld [vmem:[%s4262_s2 + $0x124] ss:$8 sps:$4 sm:$0xff]  }
   0xe   :  { %v2967_v36 = vld [vmem:[%s4263_s0 + $0xc] ss:$28 sps:$4 sm:$0xff]   ;;  %v2928_v41 = vld [vmem:[%s4262_s2 + $0x134] ss:$8 sps:$4 sm:$0xff]   ;;  %v2926_v42 = vld [vmem:[%s4262_s2 + $0x130] ss:$8 sps:$4 sm:$0xff]  }
   0xf   :  { %785 = vmatpush1.bf16.msra.mxu0 %v2877_v7  ;;  %v2923_v40 = vld [vmem:[%s4262_s2 + $0x120] ss:$8 sps:$4 sm:$0xff]   ;;  %v2931_v43 = vld [vmem:[%s4262_s2 + $0x144] ss:$8 sps:$4 sm:$0xff]   ;;  %v2934_v45 = vld [vmem:[%s4262_s2 + $0x154] ss:$8 sps:$4 sm:$0xff]  }
  0x10   :  { %786 = vmatprep.subr.bf16.mxu0 %v2878_v8  ;;  %v2929_v44 = vld [vmem:[%s4262_s2 + $0x140] ss:$8 sps:$4 sm:$0xff]   ;;  %v2932_v46 = vld [vmem:[%s4262_s2 + $0x150] ss:$8 sps:$4 sm:$0xff]   ;;  %v2937_v47 = vld [vmem:[%s4262_s2 + $0x164] ss:$8 sps:$4 sm:$0xff]  }
  0x11   :  { %v2935_v48 = vld [vmem:[%s4262_s2 + $0x160] ss:$8 sps:$4 sm:$0xff]   ;;  %v2940_v49 = vld [vmem:[%s4262_s2 + $0x174] ss:$8 sps:$4 sm:$0xff]   ;;  %v2938_v50 = vld [vmem:[%s4262_s2 + $0x170] ss:$8 sps:$4 sm:$0xff]  }
  0x12   :  { %v2943_v51 = vld [vmem:[%s4262_s2 + $0x184] ss:$8 sps:$4 sm:$0xff]   ;;  %v2941_v52 = vld [vmem:[%s4262_s2 + $0x180] ss:$8 sps:$4 sm:$0xff]   ;;  %v2946_v53 = vld [vmem:[%s4262_s2 + $0x194] ss:$8 sps:$4 sm:$0xff]  }
  0x13   :  { %787 = vmatpush1.bf16.msra.mxu0 %v2880_v9  ;;  %v2944_v54 = vld [vmem:[%s4262_s2 + $0x190] ss:$8 sps:$4 sm:$0xff]   ;;  %v2949_v55 = vld [vmem:[%s4262_s2 + $0x1a4] ss:$8 sps:$4 sm:$0xff]   ;;  %v2947_v58 = vld [vmem:[%s4262_s2 + $0x1a0] ss:$8 sps:$4 sm:$0xff]  }
  0x14   :  { %788 = vmatprep.subr.bf16.mxu0 %v2881_v10  ;;  %v3044_v56 = vld [vmem:[%s4264_s4 + $0x40] sm:$0xff]   ;;  %v3046_v59 = vld [vmem:[%s4264_s4 + $0x48] sm:$0xff]   ;;  %v3048_v61 = vld [vmem:[%s4264_s4 + $0x50] sm:$0xff]  }
  0x15   :  { %v3045_v57 = vld [vmem:[%s4264_s4] sm:$0xff]   ;;  %2762 = vmatprep.subr.bf16.mxu1 %v3044_v56  ;;  %v3047_v60 = vld [vmem:[%s4264_s4 + $0x8] sm:$0xff]   ;;  %v2952_v62 = vld [vmem:[%s4262_s2 + $0x1b4] ss:$8 sps:$4 sm:$0xff]  }
  0x16   :  { %2763 = vmatpush3.bf16.msra.mxu1 %v3045_v57  ;;  %v2950_v63 = vld [vmem:[%s4262_s2 + $0x1b0] ss:$8 sps:$4 sm:$0xff]   ;;  %v2955_v2 = vld [vmem:[%s4262_s2 + $0x1c4] ss:$8 sps:$4 sm:$0xff]   ;;  %v2953_v3 = vld [vmem:[%s4262_s2 + $0x1c0] ss:$8 sps:$4 sm:$0xff]  }
  0x17   :  { %789 = vmatpush1.bf16.msra.mxu0 %v2883_v11  ;;  %2764 = vmatprep.subr.bf16.mxu1 %v3046_v59  ;;  %v3049_v0 = vld [vmem:[%s4264_s4 + $0x10] sm:$0xff]   ;;  %v3050_v1 = vld [vmem:[%s4264_s4 + $0x58] sm:$0xff]   ;;  %v3052_v6 = vld [vmem:[%s4264_s4 + $0x60] sm:$0xff]  }
  0x18   :  { %790 = vmatprep.subr.bf16.mxu0 %v2884_v12  ;;  %v3051_v4 = vld [vmem:[%s4264_s4 + $0x18] sm:$0xff]   ;;  %v3053_v7 = vld [vmem:[%s4264_s4 + $0x20] sm:$0xff]   ;;  %v3054_v9 = vld [vmem:[%s4264_s4 + $0x68] sm:$0xff]  }
  0x19   :  { %v2958_v5 = vld [vmem:[%s4262_s2 + $0x1d4] ss:$8 sps:$4 sm:$0xff]   ;;  %v2956_v8 = vld [vmem:[%s4262_s2 + $0x1d0] ss:$8 sps:$4 sm:$0xff]   ;;  %v2961_v10 = vld [vmem:[%s4262_s2 + $0x1e4] ss:$8 sps:$4 sm:$0xff]  }
  0x1a   :  { %2765 = vmatpush3.bf16.msra.mxu1 %v3047_v60  ;;  %v2959_v11 = vld [vmem:[%s4262_s2 + $0x1e0] ss:$8 sps:$4 sm:$0xff]   ;;  %v2964_v12 = vld [vmem:[%s4262_s2 + $0x1f4] ss:$8 sps:$4 sm:$0xff]   ;;  %v2962_v13 = vld [vmem:[%s4262_s2 + $0x1f0] ss:$8 sps:$4 sm:$0xff]  }
  0x1b   :  { %791 = vmatpush1.bf16.msra.mxu0 %v2886_v14  ;;  %2766 = vmatprep.subr.bf16.mxu1 %v3048_v61  ;;  %v2970_v14 = vld [vmem:[%s4262_s2 + $0x204] ss:$8 sps:$4 sm:$0xff]   ;;  %v3030_v56 = vld [vmem:[%s4262_s2 + $0x334] ss:$8 sps:$4 sm:$0xff]   ;;  %v3028_v57 = vld [vmem:[%s4262_s2 + $0x330] ss:$8 sps:$4 sm:$0xff]  }
  0x1c   :  { %792 = vmatprep.subr.bf16.mxu0 %v2887_v15  ;;  %v2965_v15 = vld [vmem:[%s4263_s0 + $0x8] ss:$28 sps:$4 sm:$0xff]   ;;  %v3036_v60 = vld [vmem:[%s4262_s2 + $0x354] ss:$8 sps:$4 sm:$0xff]   ;;  %v3034_v61 = vld [vmem:[%s4262_s2 + $0x350] ss:$8 sps:$4 sm:$0xff]  }
  0x1d   :  { %v3031_v59 = vld [vmem:[%s4262_s2 + $0x340] ss:$8 sps:$4 sm:$0xff]  }
  0x1e   :  { %2767 = vmatpush3.bf16.msra.mxu1 %v3049_v0  ;;  %v3042_v0 = vld [vmem:[%s4262_s2 + $0x374] ss:$8 sps:$4 sm:$0xff]  }
  0x1f   :  { %793 = vmatpush1.bf16.msra.mxu0 %v2889_v16  ;;  %2768 = vmatprep.subr.bf16.mxu1 %v3050_v1  ;;  %v2968_v16 = vld [vmem:[%s4262_s2 + $0x200] ss:$8 sps:$4 sm:$0xff]   ;;  %v3040_v1 = vld [vmem:[%s4262_s2 + $0x370] ss:$8 sps:$4 sm:$0xff]  }
  0x20   :  { %794 = vmatprep.subr.bf16.mxu0 %v2890_v17  ;;  %v3018_v17 = vld [vmem:[%s4263_s0 + $0x14] ss:$28 sps:$4 sm:$0xff]  }
  0x22   :  { %2769 = vmatpush3.bf16.msra.mxu1 %v3051_v4  ;;  %v3056_v4 = vld [vmem:[%s4264_s4 + $0x70] sm:$0xff]  }
  0x23   :  { %795 = vmatpush1.bf16.msra.mxu0 %v2892_v18  ;;  %2770 = vmatprep.subr.bf16.mxu1 %v3052_v6  ;;  %v2973_v18 = vld [vmem:[%s4262_s2 + $0x214] ss:$8 sps:$4 sm:$0xff]  }
  0x24   :  { %796 = vmatprep.subr.bf16.mxu0 %v2893_v19  ;;  %v2971_v19 = vld [vmem:[%s4262_s2 + $0x210] ss:$8 sps:$4 sm:$0xff]  }
  0x25   :  { %v3058_v6 = vld [vmem:[%s4264_s4 + $0x78] sm:$0xff]  }
  0x26   :  { %2771 = vmatpush3.bf16.msra.mxu1 %v3053_v7  ;;  %v3059_v7 = vld [vmem:[%s4264_s4 + $0x38] sm:$0xff]  }
  0x27   :  { %797 = vmatpush1.bf16.msra.mxu0 %v2895_v20  ;;  %2772 = vmatprep.subr.bf16.mxu1 %v3054_v9  ;;  %v2976_v20 = vld [vmem:[%s4262_s2 + $0x224] ss:$8 sps:$4 sm:$0xff]   ;;  %v172_v9 = vlaneseq }
  0x28   :  { %798 = vmatprep.subr.bf16.mxu0 %v2896_v21  ;;  %v2974_v21 = vld [vmem:[%s4262_s2 + $0x220] ss:$8 sps:$4 sm:$0xff]  }
  0x2b   :  { %799 = vmatpush1.bf16.msra.mxu0 %v2898_v22  ;;  %v2979_v22 = vld [vmem:[%s4262_s2 + $0x234] ss:$8 sps:$4 sm:$0xff]  }
  0x2c   :  { %800 = vmatprep.subr.bf16.mxu0 %v2899_v23  ;;  %v2977_v23 = vld [vmem:[%s4262_s2 + $0x230] ss:$8 sps:$4 sm:$0xff]  }
  0x2f   :  { %801 = vmatpush1.bf16.msra.mxu0 %v2901_v24  ;;  %v2982_v24 = vld [vmem:[%s4262_s2 + $0x244] ss:$8 sps:$4 sm:$0xff]  }
  0x30   :  { %802 = vmatprep.subr.bf16.mxu0 %v2902_v25  ;;  %v2980_v25 = vld [vmem:[%s4262_s2 + $0x240] ss:$8 sps:$4 sm:$0xff]  }
  0x33   :  { %803 = vmatpush1.bf16.msra.mxu0 %v2904_v26  ;;  %v2985_v26 = vld [vmem:[%s4262_s2 + $0x254] ss:$8 sps:$4 sm:$0xff]  }
  0x34   :  { %804 = vmatprep.subr.bf16.mxu0 %v2905_v27  ;;  %v2983_v27 = vld [vmem:[%s4262_s2 + $0x250] ss:$8 sps:$4 sm:$0xff]  }
  0x37   :  { %805 = vmatpush1.bf16.msra.mxu0 %v2907_v28  ;;  %v2988_v28 = vld [vmem:[%s4262_s2 + $0x264] ss:$8 sps:$4 sm:$0xff]  }
  0x38   :  { %806 = vmatprep.subr.bf16.mxu0 %v2908_v29  ;;  %v2986_v29 = vld [vmem:[%s4262_s2 + $0x260] ss:$8 sps:$4 sm:$0xff]  }
  0x3b   :  { %807 = vmatpush1.bf16.msra.mxu0 %v2910_v30  ;;  %v2991_v30 = vld [vmem:[%s4262_s2 + $0x274] ss:$8 sps:$4 sm:$0xff]  }
  0x3c   :  { %808 = vmatprep.subr.bf16.mxu0 %v2911_v31  ;;  %v2989_v31 = vld [vmem:[%s4262_s2 + $0x270] ss:$8 sps:$4 sm:$0xff]  }
  0x3f   :  { %809 = vmatpush1.bf16.msra.mxu0 %v2913_v32  ;;  %v2994_v32 = vld [vmem:[%s4262_s2 + $0x284] ss:$8 sps:$4 sm:$0xff]  }
  0x40   :  { %821 = vmatprep.subr.bf16.mxu0 %v2919_v33  ;;  %v2992_v33 = vld [vmem:[%s4262_s2 + $0x280] ss:$8 sps:$4 sm:$0xff]  }
  0x42   :  { %811 = vmatmul.mubr.bf16.vlgmr.msra.gmra.mrb[0].mxu0 %v2914_v34  ;;  %v2997_v34 = vld [vmem:[%s4262_s2 + $0x294] ss:$8 sps:$4 sm:$0xff]  }
  0x43   :  { %822 = vmatpush1.bf16.msra.mxu0 %v2917_v35  ;;  %853 = vmatprep.mubr.bf16.mxu0 %v2967_v36  ;;  %v2995_v35 = vld [vmem:[%s4262_s2 + $0x290] ss:$8 sps:$4 sm:$0xff]   ;;  %v3000_v36 = vld [vmem:[%s4262_s2 + $0x2a4] ss:$8 sps:$4 sm:$0xff]  }
  0x44   :  { %823 = vmatprep.subr.bf16.mxu0 %v2922_v37  ;;  %v2998_v37 = vld [vmem:[%s4262_s2 + $0x2a0] ss:$8 sps:$4 sm:$0xff]  }
  0x47   :  { %824 = vmatpush1.bf16.msra.mxu0 %v2920_v38  ;;  %v3003_v38 = vld [vmem:[%s4262_s2 + $0x2b4] ss:$8 sps:$4 sm:$0xff]  }
  0x48   :  { %825 = vmatprep.subr.bf16.mxu0 %v2925_v39  ;;  %v3001_v39 = vld [vmem:[%s4262_s2 + $0x2b0] ss:$8 sps:$4 sm:$0xff]  }
  0x4b   :  { %826 = vmatpush1.bf16.msra.mxu0 %v2923_v40  ;;  %v3006_v40 = vld [vmem:[%s4262_s2 + $0x2c4] ss:$8 sps:$4 sm:$0xff]  }
  0x4c   :  { %827 = vmatprep.subr.bf16.mxu0 %v2928_v41  ;;  %v3004_v41 = vld [vmem:[%s4262_s2 + $0x2c0] ss:$8 sps:$4 sm:$0xff]  }
  0x4f   :  { %828 = vmatpush1.bf16.msra.mxu0 %v2926_v42  ;;  %v3009_v42 = vld [vmem:[%s4262_s2 + $0x2d4] ss:$8 sps:$4 sm:$0xff]  }
  0x50   :  { %829 = vmatprep.subr.bf16.mxu0 %v2931_v43  ;;  %v3007_v43 = vld [vmem:[%s4262_s2 + $0x2d0] ss:$8 sps:$4 sm:$0xff]  }
  0x53   :  { %830 = vmatpush1.bf16.msra.mxu0 %v2929_v44  ;;  %v3012_v44 = vld [vmem:[%s4262_s2 + $0x2e4] ss:$8 sps:$4 sm:$0xff]  }
  0x54   :  { %831 = vmatprep.subr.bf16.mxu0 %v2934_v45  ;;  %v3010_v45 = vld [vmem:[%s4262_s2 + $0x2e0] ss:$8 sps:$4 sm:$0xff]  }
  0x57   :  { %832 = vmatpush1.bf16.msra.mxu0 %v2932_v46  ;;  %v3015_v46 = vld [vmem:[%s4262_s2 + $0x2f4] ss:$8 sps:$4 sm:$0xff]  }
  0x58   :  { %833 = vmatprep.subr.bf16.mxu0 %v2937_v47  ;;  %v3013_v47 = vld [vmem:[%s4262_s2 + $0x2f0] ss:$8 sps:$4 sm:$0xff]  }
  0x5b   :  { %834 = vmatpush1.bf16.msra.mxu0 %v2935_v48  ;;  %v3021_v48 = vld [vmem:[%s4262_s2 + $0x304] ss:$8 sps:$4 sm:$0xff]  }
  0x5c   :  { %835 = vmatprep.subr.bf16.mxu0 %v2940_v49  ;;  %v3016_v49 = vld [vmem:[%s4263_s0 + $0x10] ss:$28 sps:$4 sm:$0xff]  }
  0x5f   :  { %836 = vmatpush1.bf16.msra.mxu0 %v2938_v50  ;;  %v3019_v50 = vld [vmem:[%s4262_s2 + $0x300] ss:$8 sps:$4 sm:$0xff]  }
  0x60   :  { %837 = vmatprep.subr.bf16.mxu0 %v2943_v51  ;;  %v3024_v51 = vld [vmem:[%s4262_s2 + $0x314] ss:$8 sps:$4 sm:$0xff]  }
  0x63   :  { %838 = vmatpush1.bf16.msra.mxu0 %v2941_v52  ;;  %v3022_v52 = vld [vmem:[%s4262_s2 + $0x310] ss:$8 sps:$4 sm:$0xff]  }
  0x64   :  { %839 = vmatprep.subr.bf16.mxu0 %v2946_v53  ;;  %v3258_v53 = vmov 0  }
  0x67   :  { %840 = vmatpush1.bf16.msra.mxu0 %v2944_v54  ;;  %v3027_v54 = vld [vmem:[%s4262_s2 + $0x324] ss:$8 sps:$4 sm:$0xff]  }
  0x68   :  { %841 = vmatprep.subr.bf16.mxu0 %v2949_v55  ;;  %v3025_v55 = vld [vmem:[%s4262_s2 + $0x320] ss:$8 sps:$4 sm:$0xff]  }
  0x6b   :  { %842 = vmatpush1.bf16.msra.mxu0 %v2947_v58  ;;  %v3033_v58 = vld [vmem:[%s4262_s2 + $0x344] ss:$8 sps:$4 sm:$0xff]  }
  0x6c   :  { %843 = vmatprep.subr.bf16.mxu0 %v2952_v62  ;;  %v3039_v62 = vld [vmem:[%s4262_s2 + $0x364] ss:$8 sps:$4 sm:$0xff]  }
  0x6f   :  { %844 = vmatpush1.bf16.msra.mxu0 %v2950_v63  ;;  %v3037_v63 = vld [vmem:[%s4262_s2 + $0x360] ss:$8 sps:$4 sm:$0xff]  }
  0x70   :  { %845 = vmatprep.subr.bf16.mxu0 %v2955_v2  ;;  %v3043_v2 = vld [vmem:[%s4263_s0 + $0x18] ss:$28 sps:$4 sm:$0xff]  }
  0x73   :  { %846 = vmatpush1.bf16.msra.mxu0 %v2953_v3  ;;  %v3055_v3 = vld [vmem:[%s4264_s4 + $0x28] sm:$0xff]  }
  0x74   :  { %847 = vmatprep.subr.bf16.mxu0 %v2958_v5  ;;  %2773 = vmatpush3.bf16.msra.mxu1 %v3055_v3  ;;  %v3057_v5 = vld [vmem:[%s4264_s4 + $0x30] sm:$0xff]   ;;  %v1253_v3 = vld [vmem:[%s4272_s1] sm:$0xff] }
  0x75   :  { %2774 = vmatprep.subr.bf16.mxu1 %v3056_v4 }
  0x77   :  { %848 = vmatpush1.bf16.msra.mxu0 %v2956_v8  ;;  %v3259_v8 = vmov 0.0  }
  0x78   :  { %849 = vmatprep.subr.bf16.mxu0 %v2961_v10  ;;  %2775 = vmatpush3.bf16.msra.mxu1 %v3057_v5  ;;  %v3749_v10 = vshrl.u32 %v172_v9, 7  ;;  %v1254_v5 = vld [vmem:[%s4272_s1 + $0x8] sm:$0xff] }
  0x79   :  { %2776 = vmatprep.subr.bf16.mxu1 %v3058_v6 }
  0x7b   :  { %850 = vmatpush1.bf16.msra.mxu0 %v2959_v11  ;;  %v3752_v11 = vsub.s32 0, %v3749_v10 }
  0x7c   :  { %851 = vmatprep.subr.bf16.mxu0 %v2964_v12  ;;  %2777 = vmatpush3.bf16.msra.mxu1 %v3059_v7  ;;  %v170_v12 = vld [vmem:[%s4266_s3] sm:$0x3] }
  0x7d   :  { %2818 = vmatprep.subr.bf16.mxu1 %v3259_v8 }
  0x7f   :  { %852 = vmatpush1.bf16.msra.mxu0 %v2962_v13  ;;  %v3758_v13 = vsub.s32 1, %v3749_v10 }
  0x80   :  { %864 = vmatprep.subr.bf16.mxu0 %v2970_v14  ;;  %v175_v14 = vrot.slane %v170_v12, %v3752_v11 }
  0x82   :  { %854 = vmatmul.mubr.bf16.vlgmr.msra.gmra.mrb[0].mxu0 %v2965_v15  ;;  %v179_v15 = vrot.slane %v170_v12, %v3758_v13 }
  0x83   :  { %865 = vmatpush1.bf16.msra.mxu0 %v2968_v16  ;;  %896 = vmatprep.mubr.bf16.mxu0 %v3018_v17 }
  0x84   :  { %866 = vmatprep.subr.bf16.mxu0 %v2973_v18 }
  0x87   :  { %867 = vmatpush1.bf16.msra.mxu0 %v2971_v19 }
  0x88   :  { %868 = vmatprep.subr.bf16.mxu0 %v2976_v20 }
  0x8b   :  { %869 = vmatpush1.bf16.msra.mxu0 %v2974_v21 }
  0x8c   :  { %870 = vmatprep.subr.bf16.mxu0 %v2979_v22 }
  0x8f   :  { %871 = vmatpush1.bf16.msra.mxu0 %v2977_v23 }
  0x90   :  { %872 = vmatprep.subr.bf16.mxu0 %v2982_v24 }
  0x93   :  { %873 = vmatpush1.bf16.msra.mxu0 %v2980_v25 }
  0x94   :  { %874 = vmatprep.subr.bf16.mxu0 %v2985_v26 }
  0x97   :  { %875 = vmatpush1.bf16.msra.mxu0 %v2983_v27 }
  0x98   :  { %876 = vmatprep.subr.bf16.mxu0 %v2988_v28 }
  0x9b   :  { %877 = vmatpush1.bf16.msra.mxu0 %v2986_v29 }
  0x9c   :  { %878 = vmatprep.subr.bf16.mxu0 %v2991_v30  ;;  %v3060_v30 = vld [vmem:[%s4265_s6] sm:$0xff]  }
  0x9f   :  { %879 = vmatpush1.bf16.msra.mxu0 %v2989_v31  ;;  %v3061_v31 = vld [vmem:[%s4265_s6 + $0x8] sm:$0xff]  }
  0xa0   :  { %880 = vmatprep.subr.bf16.mxu0 %v2994_v32  ;;  %v3062_v32 = vld [vmem:[%s4265_s6 + $0x10] sm:$0xff]  }
  0xa3   :  { %881 = vmatpush1.bf16.msra.mxu0 %v2992_v33  ;;  %v3063_v33 = vld [vmem:[%s4265_s6 + $0x18] sm:$0xff]  }
  0xa4   :  { %882 = vmatprep.subr.bf16.mxu0 %v2997_v34  ;;  %v3064_v34 = vld [vmem:[%s4265_s6 + $0x20] sm:$0xff]  }
  0xa7   :  { %883 = vmatpush1.bf16.msra.mxu0 %v2995_v35  ;;  %v3065_v35 = vld [vmem:[%s4265_s6 + $0x28] sm:$0xff]  }
  0xa8   :  { %884 = vmatprep.subr.bf16.mxu0 %v3000_v36  ;;  %v3066_v36 = vld [vmem:[%s4265_s6 + $0x30] sm:$0xff]  }
  0xab   :  { %885 = vmatpush1.bf16.msra.mxu0 %v2998_v37  ;;  %v3067_v37 = vld [vmem:[%s4265_s6 + $0x38] sm:$0xff]  }
  0xac   :  { %886 = vmatprep.subr.bf16.mxu0 %v3003_v38 }
  0xaf   :  { %887 = vmatpush1.bf16.msra.mxu0 %v3001_v39  ;;  %v2588_v39 = vld [vmem:[%s4267_s5] ss:$0 sm:$0xff] }
  0xb0   :  { %888 = vmatprep.subr.bf16.mxu0 %v3006_v40 }
  0xb3   :  { %889 = vmatpush1.bf16.msra.mxu0 %v3004_v41 }
  0xb4   :  { %890 = vmatprep.subr.bf16.mxu0 %v3009_v42 }
  0xb7   :  { %891 = vmatpush1.bf16.msra.mxu0 %v3007_v43 }
  0xb8   :  { %892 = vmatprep.subr.bf16.mxu0 %v3012_v44 }
  0xbb   :  { %893 = vmatpush1.bf16.msra.mxu0 %v3010_v45 }
  0xbc   :  { %894 = vmatprep.subr.bf16.mxu0 %v3015_v46 }
  0xbf   :  { %895 = vmatpush1.bf16.msra.mxu0 %v3013_v47 }
  0xc0   :  { %907 = vmatprep.subr.bf16.mxu0 %v3021_v48 }
  0xc2   :  { %897 = vmatmul.mubr.bf16.vlgmr.msra.gmra.mrb[0].mxu0 %v3016_v49 }
  0xc3   :  { %908 = vmatpush1.bf16.msra.mxu0 %v3019_v50  ;;  %939 = vmatprep.mubr.bf16.mxu0 %v3258_v53  ;;  %v2605_v50 = vld [vmem:[%s4268_s7] ss:$0 sm:$0xff] }
  0xc4   :  { %909 = vmatprep.subr.bf16.mxu0 %v3024_v51 }
  0xc7   :  { %910 = vmatpush1.bf16.msra.mxu0 %v3022_v52 }
  0xc8   :  { %911 = vmatprep.subr.bf16.mxu0 %v3027_v54 }
  0xcb   :  { %912 = vmatpush1.bf16.msra.mxu0 %v3025_v55 }
  0xcc   :  { %913 = vmatprep.subr.bf16.mxu0 %v3030_v56 }
  0xcf   :  { %914 = vmatpush1.bf16.msra.mxu0 %v3028_v57 }
  0xd0   :  { %915 = vmatprep.subr.bf16.mxu0 %v3033_v58 }
  0xd3   :  { %916 = vmatpush1.bf16.msra.mxu0 %v3031_v59 }
  0xd4   :  { %917 = vmatprep.subr.bf16.mxu0 %v3036_v60 }
  0xd7   :  { %918 = vmatpush1.bf16.msra.mxu0 %v3034_v61  ;;  %v3068_v61 = vld [vmem:[%s4270_s8] sm:$0xff]  }
  0xd8   :  { %919 = vmatprep.subr.bf16.mxu0 %v3039_v62 }
  0xdb   :  { %920 = vmatpush1.bf16.msra.mxu0 %v3037_v63  ;;  %v3069_v63 = vld [vmem:[%s4270_s8 + $0x8] sm:$0xff]  }
  0xdc   :  { %921 = vmatprep.subr.bf16.mxu0 %v3042_v0 }
  0xdf   :  { %922 = vmatpush1.bf16.msra.mxu0 %v3040_v1  ;;  %v3072_v1 = vld [vmem:[%s4271_s10 + $0x4] ss:$8 sps:$4 sm:$0xff]  }
  0xe2   :  { %940 = vmatmul.mubr.bf16.vlgmr.msra.gmra.mrb[0].mxu0 %v3043_v2 }
 0x1b5   :  { %v941_v16 = vpop.f32.mrb[0].mxu0 }
 0x1b6   :  { %v2846_v17 = vadd.f32 %v941_v16, %v175_v14  ;;  %v943_v18 = vpop.f32.mrb[1].mxu0  ;;  %v3075_v16 = vld [vmem:[%s4271_s10 + $0x14] ss:$8 sps:$4 sm:$0xff]  }
 0x1b7   :  { %v2847_v19 = vadd.f32 %v943_v18, %v179_v15  ;;  %v945_v20 = vpop.f32.mrb[2].mxu0  ;;  %v3078_v18 = vld [vmem:[%s4271_s10 + $0x24] ss:$8 sps:$4 sm:$0xff]  }
 0x1b8   :  { %v2848_v21 = vadd.f32 %v945_v20, %v175_v14  ;;  %v947_v22 = vpop.f32.mrb[3].mxu0  ;;  %v950_v24 = vmax.f32 %v2846_v17, 0.0  ;;  %v3070_v14 = vld [vmem:[%s4271_s10] ss:$8 sps:$4 sm:$0xff]   ;;  %v3073_v17 = vld [vmem:[%s4271_s10 + $0x10] ss:$8 sps:$4 sm:$0xff]  }
 0x1b9   :  { %v2849_v23 = vadd.f32 %v947_v22, %v179_v15  ;;  %v951_v26 = vmax.f32 %v2847_v19, 0.0  ;;  %v3076_v19 = vld [vmem:[%s4271_s10 + $0x20] ss:$8 sps:$4 sm:$0xff]   ;;  %v3081_v20 = vld [vmem:[%s4271_s10 + $0x34] ss:$8 sps:$4 sm:$0xff]  }
 0x1ba   :  { %v952_v25 = vmax.f32 %v2848_v21, 0.0  ;;  %v3084_v21 = vld [vmem:[%s4271_s10 + $0x44] ss:$8 sps:$4 sm:$0xff]   ;;  %v3082_v22 = vld [vmem:[%s4271_s10 + $0x40] ss:$8 sps:$4 sm:$0xff]  }
 0x1bb   :  { %v953_v27 = vmax.f32 %v2849_v23, 0.0  ;;  %v3087_v23 = vld [vmem:[%s4271_s10 + $0x54] ss:$8 sps:$4 sm:$0xff]  }
 0x1bc   :  { %v954_v28 = vpack.c.bf16 %v952_v25, %v950_v24  ;;  %v3085_v24 = vld [vmem:[%s4271_s10 + $0x50] ss:$8 sps:$4 sm:$0xff]   ;;  %v3090_v25 = vld [vmem:[%s4271_s10 + $0x64] ss:$8 sps:$4 sm:$0xff]  }
 0x1bd   :  { %v955_v29 = vpack.c.bf16 %v953_v27, %v951_v26  ;;  %v3088_v26 = vld [vmem:[%s4271_s10 + $0x60] ss:$8 sps:$4 sm:$0xff]   ;;  %v3093_v27 = vld [vmem:[%s4271_s10 + $0x74] ss:$8 sps:$4 sm:$0xff]  }
 0x1bf   :  { %1123 = vmatprep.mubr.bf16.mxu1 %v955_v29  ;;  %v3096_v29 = vld [vmem:[%s4273_s12 + $0x4] ss:$28 sps:$4 sm:$0xff]  }
 0x1c0   :  { %1124 = vmatmul.mubr.bf16.vlgmr.msra.gmra.mrb[0].mxu1 %v954_v28  ;;  %v3091_v28 = vld [vmem:[%s4271_s10 + $0x70] ss:$8 sps:$4 sm:$0xff]  }
 0x1c1   :  { %2819 = vmatpush3.bf16.msra.mxu1 %v3060_v30  ;;  %2834 = vmatprep.mubr.msk.bf16.mxu1 %vm3260_vm0, %v3259_v8  ;;  %v3097_v30 = vld [vmem:[%s4273_s12 + $0x10] ss:$28 sps:$4 sm:$0xff]  }
 0x1c2   :  { %2820 = vmatprep.subr.bf16.mxu1 %v3259_v8 }
 0x1c5   :  { %2821 = vmatpush3.bf16.msra.mxu1 %v3061_v31  ;;  %v3099_v31 = vld [vmem:[%s4273_s12 + $0x14] ss:$28 sps:$4 sm:$0xff]  }
 0x1c6   :  { %2822 = vmatprep.subr.bf16.mxu1 %v3259_v8  ;;  %2323 = vmatprep.subr.bf16.mxu0 %v3099_v31  ;;  %v3166_v31 = vld [vmem:[%s4273_s12 + $0x2a0] ss:$28 sps:$4 sm:$0xff]  }
 0x1c7   :  { %2324 = vmatpush1.bf16.msra.mxu0 %v3097_v30  ;;  %v3168_v30 = vld [vmem:[%s4273_s12 + $0x2a4] ss:$28 sps:$4 sm:$0xff]  }
 0x1c9   :  { %2823 = vmatpush3.bf16.msra.mxu1 %v3062_v32  ;;  %v3103_v32 = vld [vmem:[%s4273_s12 + $0x48] ss:$28 sps:$4 sm:$0xff]  }
 0x1ca   :  { %2824 = vmatprep.subr.bf16.mxu1 %v3259_v8 }
 0x1cd   :  { %2825 = vmatpush3.bf16.msra.mxu1 %v3063_v33  ;;  %v3105_v33 = vld [vmem:[%s4273_s12 + $0x4c] ss:$28 sps:$4 sm:$0xff]  }
 0x1ce   :  { %2826 = vmatprep.subr.bf16.mxu1 %v3259_v8  ;;  %2325 = vmatprep.subr.bf16.mxu0 %v3105_v33  ;;  %v3172_v33 = vld [vmem:[%s4273_s12 + $0x2d8] ss:$28 sps:$4 sm:$0xff]  }
 0x1cf   :  { %2326 = vmatpush1.bf16.msra.mxu0 %v3103_v32  ;;  %v3174_v32 = vld [vmem:[%s4273_s12 + $0x2dc] ss:$28 sps:$4 sm:$0xff]  }
 0x1d1   :  { %2827 = vmatpush3.bf16.msra.mxu1 %v3064_v34  ;;  %v3111_v34 = vld [vmem:[%s4273_s12 + $0x84] ss:$28 sps:$4 sm:$0xff]  }
 0x1d2   :  { %2828 = vmatprep.subr.bf16.mxu1 %v3259_v8  ;;  %2327 = vmatprep.subr.bf16.mxu0 %v3111_v34  ;;  %v3180_v34 = vld [vmem:[%s4273_s12 + $0x314] ss:$28 sps:$4 sm:$0xff]  }
 0x1d5   :  { %2829 = vmatpush3.bf16.msra.mxu1 %v3065_v35  ;;  %v3109_v35 = vld [vmem:[%s4273_s12 + $0x80] ss:$28 sps:$4 sm:$0xff]  }
 0x1d6   :  { %2830 = vmatprep.subr.bf16.mxu1 %v3259_v8  ;;  %2328 = vmatpush1.bf16.msra.mxu0 %v3109_v35  ;;  %v3178_v35 = vld [vmem:[%s4273_s12 + $0x310] ss:$28 sps:$4 sm:$0xff]  }
 0x1d9   :  { %2831 = vmatpush3.bf16.msra.mxu1 %v3066_v36  ;;  %v3117_v36 = vld [vmem:[%s4273_s12 + $0xbc] ss:$28 sps:$4 sm:$0xff]  }
 0x1da   :  { %2832 = vmatprep.subr.bf16.mxu1 %v3259_v8  ;;  %2329 = vmatprep.subr.bf16.mxu0 %v3117_v36  ;;  %v3183_v36 = vld [vmem:[%s4273_s12 + $0x324] ss:$28 sps:$4 sm:$0xff]  }
 0x1dd   :  { %2833 = vmatpush3.bf16.msra.mxu1 %v3067_v37  ;;  %v3115_v37 = vld [vmem:[%s4273_s12 + $0xb8] ss:$28 sps:$4 sm:$0xff]  }
 0x1de   :  { %2838 = vmatprep.subr.bf16.mxu1 %v3259_v8  ;;  %2330 = vmatpush1.bf16.msra.mxu0 %v3115_v37  ;;  %v3181_v37 = vld [vmem:[%s4273_s12 + $0x320] ss:$28 sps:$4 sm:$0xff]  }
 0x293   :  { %v2778_v38 = vpop.f32.mrb[0].mxu1 }
 0x294   :  { %v2779_v40 = vpop.f32.mrb[1].mxu1 }
 0x295   :  { %v2780_v41 = vadd.f32 %v2779_v40, %v2778_v38  ;;  %v2781_v42 = vpop.f32.mrb[2].mxu1  ;;  %v3123_v38 = vld [vmem:[%s4273_s12 + $0xf4] ss:$28 sps:$4 sm:$0xff]   ;;  %v3129_v40 = vld [vmem:[%s4273_s12 + $0x12c] ss:$28 sps:$4 sm:$0xff]  }
 0x296   :  { %v2782_v43 = vpop.f32.mrb[3].mxu1  ;;  %2331 = vmatprep.subr.bf16.mxu0 %v3123_v38  ;;  %v3186_v38 = vld [vmem:[%s4273_s12 + $0x34c] ss:$28 sps:$4 sm:$0xff]  }
 0x297   :  { %v1126_v44 = vadd.f32 %v2780_v41, %v2588_v39  ;;  %v2783_v45 = vadd.f32 %v2782_v43, %v2781_v42  ;;  %v3127_v41 = vld [vmem:[%s4273_s12 + $0x128] ss:$28 sps:$4 sm:$0xff]   ;;  %v3133_v43 = vld [vmem:[%s4273_s12 + $0x160] ss:$28 sps:$4 sm:$0xff]  }
 0x298   :  { %v3135_v42 = vld [vmem:[%s4273_s12 + $0x164] ss:$28 sps:$4 sm:$0xff]  }
 0x299   :  { %v1129_v46 = vadd.f32 %v2783_v45, %v2588_v39  ;;  %v1132_v47 = vmax.f32 %v1126_v44, 0.0  ;;  %v3121_v39 = vld [vmem:[%s4273_s12 + $0xf0] ss:$28 sps:$4 sm:$0xff]   ;;  %v3141_v44 = vld [vmem:[%s4273_s12 + $0x19c] ss:$28 sps:$4 sm:$0xff]  }
 0x29a   :  { %2332 = vmatpush1.bf16.msra.mxu0 %v3121_v39  ;;  %v3139_v45 = vld [vmem:[%s4273_s12 + $0x198] ss:$28 sps:$4 sm:$0xff]   ;;  %v3184_v39 = vld [vmem:[%s4273_s12 + $0x348] ss:$28 sps:$4 sm:$0xff]  }
 0x29b   :  { %v1133_v48 = vmax.f32 %v1129_v46, 0.0  ;;  %2333 = vmatprep.subr.bf16.mxu0 %v3129_v40  ;;  %v3147_v46 = vld [vmem:[%s4273_s12 + $0x1d4] ss:$28 sps:$4 sm:$0xff]   ;;  %v3189_v40 = vld [vmem:[%s4273_s12 + $0x35c] ss:$28 sps:$4 sm:$0xff]  }
 0x29d   :  { %v1134_v49 = vpack.c.bf16 %v1133_v48, %v1132_v47  ;;  %v3145_v47 = vld [vmem:[%s4273_s12 + $0x1d0] ss:$28 sps:$4 sm:$0xff]  }
 0x29e   :  { %2334 = vmatpush1.bf16.msra.mxu0 %v3127_v41  ;;  %v3153_v48 = vld [vmem:[%s4273_s12 + $0x20c] ss:$28 sps:$4 sm:$0xff]   ;;  %v3187_v41 = vld [vmem:[%s4273_s12 + $0x358] ss:$28 sps:$4 sm:$0xff]  }
 0x29f   :  { %2835 = vmatmul.mubr.bf16.vlgmr.msra.gmra.mrb[4].mxu1 %v1134_v49  ;;  %2335 = vmatprep.subr.bf16.mxu0 %v3135_v42  ;;  %v3151_v49 = vld [vmem:[%s4273_s12 + $0x208] ss:$28 sps:$4 sm:$0xff]  }
 0x2a0   :  { %2842 = vmatprep.mubr.msk.bf16.mxu1 %vm3260_vm0, %v3259_v8  ;;  %2839 = vmatpush3.bf16.msra.mxu1 %v3068_v61  ;;  %v3192_v42 = vld [vmem:[%s4273_s12 + $0xc] ss:$28 sps:$4 sm:$0xff]  }
 0x2a1   :  { %2840 = vmatprep.subr.bf16.mxu1 %v3259_v8 }
 0x2a2   :  { %2336 = vmatpush1.bf16.msra.mxu0 %v3133_v43  ;;  %v1355_v43 = vld [vmem:[%s4275_s11] sm:$0x3] }
 0x2a3   :  { %2337 = vmatprep.subr.bf16.mxu0 %v3141_v44  ;;  %v1360_v44 = vrot.slane %v1355_v43, %v3752_v11 }
 0x2a4   :  { %2841 = vmatpush3.bf16.msra.mxu1 %v3069_v63 }
 0x2a5   :  { %1447 = vmatprep.subr.bf16.mxu1 %v3072_v1 }
 0x2a6   :  { %2338 = vmatpush1.bf16.msra.mxu0 %v3139_v45  ;;  %v1364_v45 = vrot.slane %v1355_v43, %v3758_v13  ;;  %v3251_v43 = vld [vmem:[%s4273_s12 + $0x168] ss:$28 sps:$4 sm:$0xff]  }
 0x2a7   :  { %2339 = vmatprep.subr.bf16.mxu0 %v3147_v46 }
 0x2aa   :  { %2340 = vmatpush1.bf16.msra.mxu0 %v3145_v47 }
 0x2ab   :  { %2341 = vmatprep.subr.bf16.mxu0 %v3153_v48 }
 0x2ae   :  { %2342 = vmatpush1.bf16.msra.mxu0 %v3151_v49 }
 0x372   :  { %v1240_v51 = vpop.f32.mrb[4].mxu1 }
 0x373   :  { %v1241_v52 = vadd.f32 %v2605_v50, %v1240_v51  ;;  %v2836_v54 = vpop.f32.mrb[5].mxu1  ;;  %v3157_v51 = vld [vmem:[%s4273_s12 + $0x240] ss:$28 sps:$4 sm:$0xff]  }
 0x374   :  { %v1243_v55 = vpop.f32.mrb[6].mxu1  ;;  %v3163_v54 = vld [vmem:[%s4273_s12 + $0x278] ss:$28 sps:$4 sm:$0xff]  }
 0x375   :  { %v1247_v56 = vmul.f32 0.5, %v1241_v52  ;;  %2459 = vst [vmem:[%s4269_s15] sm:$0xff] %v1241_v52  ;;  %v1244_v57 = vadd.f32 %v2605_v50, %v1243_v55  ;;  %v2837_v58 = vpop.f32.mrb[7].mxu1  ;;  %v3159_v50 = vld [vmem:[%s4273_s12 + $0x244] ss:$28 sps:$4 sm:$0xff]   ;;  %v3171_v55 = vld [vmem:[%s4273_s12 + $0x2b4] ss:$28 sps:$4 sm:$0xff]  }
 0x376   :  { %2343 = vmatprep.subr.bf16.mxu0 %v3159_v50  ;;  %v3175_v58 = vld [vmem:[%s4273_s12 + $0x2e8] ss:$28 sps:$4 sm:$0xff]  }
 0x377   :  { %v1249_v59 = vmul.f32 1.442695, %v1247_v56  ;;  %v1248_v60 = vmul.f32 0.5, %v1244_v57  ;;  %2460 = vst [vmem:[%s4269_s15 + $0x8] sm:$0xff] %v1244_v57  ;;  %s3261_s15 = smov 96   ;;  %2344 = vmatpush1.bf16.msra.mxu0 %v3157_v51 }
 0x378   :  { %v3169_v56 = vld [vmem:[%s4273_s12 + $0x2b0] ss:$28 sps:$4 sm:$0xff]  }
 0x379   :  { %3254 = vpow2.f32 %v1249_v59  ;;  %v1251_v62 = vmul.f32 1.442695, %v1248_v60  ;;  %v2614_v59 = vld [vmem:[%s4274_s9] ss:$0 sm:$0xff] }
 0x37b   :  { %3256 = vpow2.f32 %v1251_v62 }
 0x383   :  { %v3255_v0 = vpop.eup %3254 }
 0x384   :  { %1257 = vrot.lane.b32.xlu0 %v3255_v0, %s3261_s15 }
 0x385   :  { %v3257_v2 = vpop.eup %3256 }
 0x388   :  { %1259 = vrot.lane.b32.xlu0 %v3257_v2, %s3261_s15 }
 0x3f6   :  { %v1258_v4 = vpop.permute.xlu0 %1257 }
 0x3f7   :  { %v1263_v6 = vmul.f32 %v1258_v4, %v1253_v3  ;;  %v3094_v4 = vld [vmem:[%s4273_s12] ss:$28 sps:$4 sm:$0xff]  }
 0x3f9   :  { %v1265_v9 = vadd.f32 %v1263_v6, %v1241_v52  ;;  %v3165_v52 = vld [vmem:[%s4273_s12 + $0x27c] ss:$28 sps:$4 sm:$0xff]  }
 0x3fa   :  { %v1260_v7 = vpop.permute.xlu0 %1259  ;;  %2345 = vmatprep.subr.bf16.mxu0 %v3165_v52  ;;  %v3102_v6 = vld [vmem:[%s4273_s12 + $0x3c] ss:$28 sps:$4 sm:$0xff]  }
 0x3fb   :  { %v1264_v8 = vmul.f32 %v1260_v7, %v1254_v5  ;;  %2346 = vmatpush1.bf16.msra.mxu0 %v3163_v54  ;;  %v3100_v7 = vld [vmem:[%s4273_s12 + $0x38] ss:$28 sps:$4 sm:$0xff]  }
 0x3fc   :  { %2347 = vmatprep.subr.bf16.mxu0 %v3171_v55 }
 0x3fd   :  { %v1266_v12 = vadd.f32 %v1264_v8, %v1244_v57  ;;  %v3177_v57 = vld [vmem:[%s4273_s12 + $0x2ec] ss:$28 sps:$4 sm:$0xff]   ;;  %v3108_v8 = vld [vmem:[%s4273_s12 + $0x74] ss:$28 sps:$4 sm:$0xff]  }
 0x3ff   :  { %v1267_v15 = vpack.c.bf16 %v1266_v12, %v1265_v9  ;;  %2348 = vmatpush1.bf16.msra.mxu0 %v3169_v56  ;;  %v3106_v9 = vld [vmem:[%s4273_s12 + $0x70] ss:$28 sps:$4 sm:$0xff]  }
 0x400   :  { %2349 = vmatprep.subr.bf16.mxu0 %v3177_v57  ;;  %v3114_v12 = vld [vmem:[%s4273_s12 + $0xac] ss:$28 sps:$4 sm:$0xff]  }
 0x401   :  { %2843 = vmatmul.mubr.msk.bf16.vlgmr.msra.gmra.mrb[8].mxu1 %vm1291_vm1, %v1267_v15  ;;  %v3120_v15 = vld [vmem:[%s4273_s12 + $0xe4] ss:$28 sps:$4 sm:$0xff]  }
 0x402   :  { %1448 = vmatpush1.bf16.msra.mxu1 %v3070_v14  ;;  %1479 = vmatprep.mubr.bf16.mxu1 %v3258_v53  ;;  %v3079_v53 = vld [vmem:[%s4271_s10 + $0x30] ss:$8 sps:$4 sm:$0xff]   ;;  %v3112_v14 = vld [vmem:[%s4273_s12 + $0xa8] ss:$28 sps:$4 sm:$0xff]  }
 0x403   :  { %1449 = vmatprep.subr.bf16.mxu1 %v3075_v16  ;;  %2350 = vmatpush1.bf16.msra.mxu0 %v3175_v58  ;;  %v3118_v16 = vld [vmem:[%s4273_s12 + $0xe0] ss:$28 sps:$4 sm:$0xff]  }
 0x404   :  { %2351 = vmatprep.subr.bf16.mxu0 %v3183_v36  ;;  %v3244_v36 = vld [vmem:[%s4273_s12 + $0x280] ss:$28 sps:$4 sm:$0xff]  }
 0x406   :  { %1450 = vmatpush1.bf16.msra.mxu1 %v3073_v17  ;;  %v3126_v17 = vld [vmem:[%s4273_s12 + $0x11c] ss:$28 sps:$4 sm:$0xff]  }
 0x407   :  { %1451 = vmatprep.subr.bf16.mxu1 %v3078_v18  ;;  %v3124_v18 = vld [vmem:[%s4273_s12 + $0x118] ss:$28 sps:$4 sm:$0xff]   ;;  %2352 = vmatpush1.bf16.msra.mxu0 %v3181_v37  ;;  %v3245_v37 = vld [vmem:[%s4273_s12 + $0xc0] ss:$28 sps:$4 sm:$0xff]  }
 0x408   :  { %2353 = vmatprep.subr.bf16.mxu0 %v3189_v40  ;;  %v3248_v40 = vld [vmem:[%s4273_s12 + $0x2f0] ss:$28 sps:$4 sm:$0xff]  }
 0x40a   :  { %1452 = vmatpush1.bf16.msra.mxu1 %v3076_v19  ;;  %v3132_v19 = vld [vmem:[%s4273_s12 + $0x154] ss:$28 sps:$4 sm:$0xff]  }
 0x40b   :  { %1453 = vmatprep.subr.bf16.mxu1 %v3081_v20  ;;  %v3130_v20 = vld [vmem:[%s4273_s12 + $0x150] ss:$28 sps:$4 sm:$0xff]   ;;  %2354 = vmatpush1.bf16.msra.mxu0 %v3187_v41 }
 0x40c   :  { %v3249_v41 = vld [vmem:[%s4273_s12 + $0x130] ss:$28 sps:$4 sm:$0xff]  }
 0x40e   :  { %1454 = vmatpush1.bf16.msra.mxu1 %v3079_v53  ;;  %v3138_v53 = vld [vmem:[%s4273_s12 + $0x18c] ss:$28 sps:$4 sm:$0xff]  }
 0x40f   :  { %1455 = vmatprep.subr.bf16.mxu1 %v3084_v21  ;;  %v3136_v21 = vld [vmem:[%s4273_s12 + $0x188] ss:$28 sps:$4 sm:$0xff]  }
 0x412   :  { %1456 = vmatpush1.bf16.msra.mxu1 %v3082_v22  ;;  %v3144_v22 = vld [vmem:[%s4273_s12 + $0x1c4] ss:$28 sps:$4 sm:$0xff]  }
 0x413   :  { %1457 = vmatprep.subr.bf16.mxu1 %v3087_v23  ;;  %v3142_v23 = vld [vmem:[%s4273_s12 + $0x1c0] ss:$28 sps:$4 sm:$0xff]  }
 0x416   :  { %1458 = vmatpush1.bf16.msra.mxu1 %v3085_v24  ;;  %v3150_v24 = vld [vmem:[%s4273_s12 + $0x1fc] ss:$28 sps:$4 sm:$0xff]  }
 0x417   :  { %1459 = vmatprep.subr.bf16.mxu1 %v3090_v25  ;;  %v3148_v25 = vld [vmem:[%s4273_s12 + $0x1f8] ss:$28 sps:$4 sm:$0xff]  }
 0x41a   :  { %1460 = vmatpush1.bf16.msra.mxu1 %v3088_v26  ;;  %v3156_v26 = vld [vmem:[%s4273_s12 + $0x234] ss:$28 sps:$4 sm:$0xff]  }
 0x41b   :  { %1461 = vmatprep.subr.bf16.mxu1 %v3093_v27  ;;  %v3154_v27 = vld [vmem:[%s4273_s12 + $0x230] ss:$28 sps:$4 sm:$0xff]  }
 0x41e   :  { %1462 = vmatpush1.bf16.msra.mxu1 %v3091_v28  ;;  %v3162_v28 = vld [vmem:[%s4273_s12 + $0x26c] ss:$28 sps:$4 sm:$0xff]  }
 0x41f   :  { %2237 = vmatprep.subr.bf16.mxu1 %v3096_v29  ;;  %v3160_v29 = vld [vmem:[%s4273_s12 + $0x268] ss:$28 sps:$4 sm:$0xff]  }
 0x4d4   :  { %v1329_v60 = vpop.f32.mrb[8].mxu1 }
 0x4d5   :  { %v1330_v61 = vadd.f32 %v2614_v59, %v1329_v60  ;;  %v2844_v62 = vpop.f32.mrb[9].mxu1 }
 0x4d6   :  { %v1332_v63 = vpop.f32.mrb[10].mxu1  ;;  %v3195_v62 = vld [vmem:[%s4273_s12 + $0x44] ss:$28 sps:$4 sm:$0xff]  }
 0x4d7   :  { %v1333_v0 = vadd.f32 %v2614_v59, %v1332_v63  ;;  %v2845_v1 = vpop.f32.mrb[11].mxu1  ;;  %v1336_v2 = vmax.f32 %v1330_v61, 0.0  ;;  %v3190_v61 = vld [vmem:[%s4273_s12 + $0x8] ss:$28 sps:$4 sm:$0xff]   ;;  %v3193_v63 = vld [vmem:[%s4273_s12 + $0x40] ss:$28 sps:$4 sm:$0xff]  }
 0x4d8   :  { %v3196_v1 = vld [vmem:[%s4273_s12 + $0x78] ss:$28 sps:$4 sm:$0xff]  }
 0x4d9   :  { %v1337_v3 = vmax.f32 %v1333_v0, 0.0  ;;  %v3198_v0 = vld [vmem:[%s4273_s12 + $0x7c] ss:$28 sps:$4 sm:$0xff]  }
 0x4db   :  { %v1338_v5 = vpack.c.bf16 %v1337_v3, %v1336_v2  ;;  %v3201_v2 = vld [vmem:[%s4273_s12 + $0xb4] ss:$28 sps:$4 sm:$0xff]  }
 0x4dc   :  { %v3199_v3 = vld [vmem:[%s4273_s12 + $0xb0] ss:$28 sps:$4 sm:$0xff]  }
 0x4dd   :  { %1480 = vmatmul.mubr.bf16.vlgmr.msra.gmra.mrb[12].mxu1 %v1338_v5  ;;  %v3202_v5 = vld [vmem:[%s4273_s12 + $0xe8] ss:$28 sps:$4 sm:$0xff]  }
 0x4de   :  { %2238 = vmatpush1.bf16.msra.mxu1 %v3094_v4  ;;  %v3204_v4 = vld [vmem:[%s4273_s12 + $0xec] ss:$28 sps:$4 sm:$0xff]  }
 0x4df   :  { %2239 = vmatprep.subr.bf16.mxu1 %v3102_v6  ;;  %v3207_v6 = vld [vmem:[%s4273_s12 + $0x124] ss:$28 sps:$4 sm:$0xff]  }
 0x4e2   :  { %2240 = vmatpush1.bf16.msra.mxu1 %v3100_v7  ;;  %v3205_v7 = vld [vmem:[%s4273_s12 + $0x120] ss:$28 sps:$4 sm:$0xff]  }
 0x4e3   :  { %2241 = vmatprep.subr.bf16.mxu1 %v3108_v8  ;;  %v3210_v8 = vld [vmem:[%s4273_s12 + $0x15c] ss:$28 sps:$4 sm:$0xff]  }
 0x4e6   :  { %2242 = vmatpush1.bf16.msra.mxu1 %v3106_v9  ;;  %v3208_v9 = vld [vmem:[%s4273_s12 + $0x158] ss:$28 sps:$4 sm:$0xff]  }
 0x4e7   :  { %2243 = vmatprep.subr.bf16.mxu1 %v3114_v12  ;;  %v3213_v12 = vld [vmem:[%s4273_s12 + $0x194] ss:$28 sps:$4 sm:$0xff]  }
 0x4ea   :  { %2244 = vmatpush1.bf16.msra.mxu1 %v3112_v14  ;;  %v3211_v14 = vld [vmem:[%s4273_s12 + $0x190] ss:$28 sps:$4 sm:$0xff]  }
 0x4eb   :  { %2245 = vmatprep.subr.bf16.mxu1 %v3120_v15  ;;  %v3216_v15 = vld [vmem:[%s4273_s12 + $0x1cc] ss:$28 sps:$4 sm:$0xff]  }
 0x4ee   :  { %2246 = vmatpush1.bf16.msra.mxu1 %v3118_v16  ;;  %v3214_v16 = vld [vmem:[%s4273_s12 + $0x1c8] ss:$28 sps:$4 sm:$0xff]  }
 0x4ef   :  { %2247 = vmatprep.subr.bf16.mxu1 %v3126_v17  ;;  %v3219_v17 = vld [vmem:[%s4273_s12 + $0x204] ss:$28 sps:$4 sm:$0xff]  }
 0x4f2   :  { %2248 = vmatpush1.bf16.msra.mxu1 %v3124_v18  ;;  %v3217_v18 = vld [vmem:[%s4273_s12 + $0x200] ss:$28 sps:$4 sm:$0xff]  }
 0x4f3   :  { %2249 = vmatprep.subr.bf16.mxu1 %v3132_v19  ;;  %v3222_v19 = vld [vmem:[%s4273_s12 + $0x23c] ss:$28 sps:$4 sm:$0xff]  }
 0x4f6   :  { %2250 = vmatpush1.bf16.msra.mxu1 %v3130_v20  ;;  %v3220_v20 = vld [vmem:[%s4273_s12 + $0x238] ss:$28 sps:$4 sm:$0xff]  }
 0x4f7   :  { %2251 = vmatprep.subr.bf16.mxu1 %v3138_v53  ;;  %v3225_v53 = vld [vmem:[%s4273_s12 + $0x274] ss:$28 sps:$4 sm:$0xff]  }
 0x4fa   :  { %2252 = vmatpush1.bf16.msra.mxu1 %v3136_v21  ;;  %v3223_v21 = vld [vmem:[%s4273_s12 + $0x270] ss:$28 sps:$4 sm:$0xff]  }
 0x4fb   :  { %2253 = vmatprep.subr.bf16.mxu1 %v3144_v22  ;;  %v3228_v22 = vld [vmem:[%s4273_s12 + $0x2ac] ss:$28 sps:$4 sm:$0xff]  }
 0x4fe   :  { %2254 = vmatpush1.bf16.msra.mxu1 %v3142_v23  ;;  %v3226_v23 = vld [vmem:[%s4273_s12 + $0x2a8] ss:$28 sps:$4 sm:$0xff]  }
 0x4ff   :  { %2255 = vmatprep.subr.bf16.mxu1 %v3150_v24  ;;  %v3231_v24 = vld [vmem:[%s4273_s12 + $0x2e4] ss:$28 sps:$4 sm:$0xff]  }
 0x502   :  { %2256 = vmatpush1.bf16.msra.mxu1 %v3148_v25  ;;  %v3229_v25 = vld [vmem:[%s4273_s12 + $0x2e0] ss:$28 sps:$4 sm:$0xff]  }
 0x503   :  { %2257 = vmatprep.subr.bf16.mxu1 %v3156_v26  ;;  %v3234_v26 = vld [vmem:[%s4273_s12 + $0x31c] ss:$28 sps:$4 sm:$0xff]  }
 0x506   :  { %2258 = vmatpush1.bf16.msra.mxu1 %v3154_v27  ;;  %v3232_v27 = vld [vmem:[%s4273_s12 + $0x318] ss:$28 sps:$4 sm:$0xff]  }
 0x507   :  { %2259 = vmatprep.subr.bf16.mxu1 %v3162_v28  ;;  %v3237_v28 = vld [vmem:[%s4273_s12 + $0x354] ss:$28 sps:$4 sm:$0xff]  }
 0x50a   :  { %2260 = vmatpush1.bf16.msra.mxu1 %v3160_v29  ;;  %v3235_v29 = vld [vmem:[%s4273_s12 + $0x350] ss:$28 sps:$4 sm:$0xff]  }
 0x50b   :  { %2261 = vmatprep.subr.bf16.mxu1 %v3168_v30  ;;  %v3238_v30 = vld [vmem:[%s4273_s12 + $0x1d8] ss:$28 sps:$4 sm:$0xff]  }
 0x50e   :  { %2262 = vmatpush1.bf16.msra.mxu1 %v3166_v31  ;;  %v3239_v31 = vld [vmem:[%s4273_s12 + $0x18] ss:$28 sps:$4 sm:$0xff]  }
 0x50f   :  { %2263 = vmatprep.subr.bf16.mxu1 %v3174_v32  ;;  %v3240_v32 = vld [vmem:[%s4273_s12 + $0x210] ss:$28 sps:$4 sm:$0xff]  }
 0x512   :  { %2264 = vmatpush1.bf16.msra.mxu1 %v3172_v33  ;;  %v3241_v33 = vld [vmem:[%s4273_s12 + $0x50] ss:$28 sps:$4 sm:$0xff]  }
 0x513   :  { %2265 = vmatprep.subr.bf16.mxu1 %v3180_v34  ;;  %v3242_v34 = vld [vmem:[%s4273_s12 + $0x248] ss:$28 sps:$4 sm:$0xff]  }
 0x516   :  { %2266 = vmatpush1.bf16.msra.mxu1 %v3178_v35  ;;  %v3243_v35 = vld [vmem:[%s4273_s12 + $0x88] ss:$28 sps:$4 sm:$0xff]  }
 0x517   :  { %2267 = vmatprep.subr.bf16.mxu1 %v3186_v38  ;;  %v3246_v38 = vld [vmem:[%s4273_s12 + $0x2b8] ss:$28 sps:$4 sm:$0xff]  }
 0x51a   :  { %2268 = vmatpush1.bf16.msra.mxu1 %v3184_v39  ;;  %v3247_v39 = vld [vmem:[%s4273_s12 + $0xf8] ss:$28 sps:$4 sm:$0xff]  }
 0x51b   :  { %2280 = vmatprep.subr.bf16.mxu1 %v3192_v42  ;;  %v3250_v42 = vld [vmem:[%s4273_s12 + $0x328] ss:$28 sps:$4 sm:$0xff]  }
 0x5b0   :  { %v1481_v46 = vpop.f32.mrb[12].mxu1 }
 0x5b1   :  { %v1482_v47 = vadd.f32 %v1481_v46, %v1360_v44  ;;  %v1483_v48 = vpop.f32.mrb[13].mxu1  ;;  %v1644_v46 = vsub.s32 4, %v3749_v10 }
 0x5b2   :  { %v1484_v49 = vadd.f32 %v1483_v48, %v1364_v45  ;;  %v1485_v50 = vpop.f32.mrb[14].mxu1  ;;  %v1648_v48 = vsub.s32 5, %v3749_v10 }
 0x5b3   :  { %v1486_v51 = vadd.f32 %v1485_v50, %v1360_v44  ;;  %v1487_v52 = vpop.f32.mrb[15].mxu1  ;;  %v1490_v55 = vmax.f32 %v1482_v47, 0.0  ;;  %v3252_v44 = vld [vmem:[%s4273_s12 + $0x360] ss:$28 sps:$4 sm:$0xff]  }
 0x5b4   :  { %v1488_v54 = vadd.f32 %v1487_v52, %v1364_v45  ;;  %v1491_v57 = vmax.f32 %v1484_v49, 0.0  ;;  %v3253_v45 = vld [vmem:[%s4273_s12 + $0x1a0] ss:$28 sps:$4 sm:$0xff]  }
 0x5b5   :  { %v1492_v56 = vmax.f32 %v1486_v51, 0.0  ;;  %v1624_v47 = vld [vmem:[%s4276_s13] sm:$0xff] }
 0x5b6   :  { %v1493_v58 = vmax.f32 %v1488_v54, 0.0  ;;  %v1629_v49 = vrot.slane %v1624_v47, %v3752_v11  ;;  %v1645_v50 = vrot.slane %v1624_v47, %v1644_v46  ;;  %v1633_v51 = vrot.slane %v1624_v47, %v3758_v13 }
 0x5b7   :  { %v4075_v59 = vpack.c.bf16 %v1492_v56, %v1490_v55  ;;  %v1649_v52 = vrot.slane %v1624_v47, %v1648_v48 }
 0x5b8   :  { %v4077_v60 = vpack.c.bf16 %v1493_v58, %v1491_v57 }
 0x5ba   :  { %2269 = vmatprep.mubr.bf16.mxu1 %v4077_v60  ;;  %2355 = vmatprep.mubr.bf16.mxu0 %v4077_v60 }
 0x5bb   :  { %2270 = vmatmul.mubr.bf16.vlgmr.msra.gmra.mrb[16].mxu1 %v4075_v59  ;;  %2356 = vmatmul.mubr.bf16.vlgmr.msra.gmra.mrb[4].mxu0 %v4075_v59 }
 0x5bc   :  { %2281 = vmatpush1.bf16.msra.mxu1 %v3190_v61  ;;  %2312 = vmatprep.mubr.bf16.mxu1 %v4077_v60 }
 0x5bd   :  { %2282 = vmatprep.subr.bf16.mxu1 %v3195_v62 }
 0x5c0   :  { %2283 = vmatpush1.bf16.msra.mxu1 %v3193_v63 }
 0x5c1   :  { %2284 = vmatprep.subr.bf16.mxu1 %v3198_v0 }
 0x5c4   :  { %2285 = vmatpush1.bf16.msra.mxu1 %v3196_v1 }
 0x5c5   :  { %2286 = vmatprep.subr.bf16.mxu1 %v3201_v2 }
 0x5c8   :  { %2287 = vmatpush1.bf16.msra.mxu1 %v3199_v3 }
 0x5c9   :  { %2288 = vmatprep.subr.bf16.mxu1 %v3204_v4 }
 0x5cc   :  { %2289 = vmatpush1.bf16.msra.mxu1 %v3202_v5 }
 0x5cd   :  { %2290 = vmatprep.subr.bf16.mxu1 %v3207_v6 }
 0x5d0   :  { %2291 = vmatpush1.bf16.msra.mxu1 %v3205_v7 }
 0x5d1   :  { %2292 = vmatprep.subr.bf16.mxu1 %v3210_v8  ;;  %v1636_v8 = vsub.s32 2, %v3749_v10 }
 0x5d4   :  { %2293 = vmatpush1.bf16.msra.mxu1 %v3208_v9  ;;  %v1640_v9 = vsub.s32 3, %v3749_v10 }
 0x5d5   :  { %2294 = vmatprep.subr.bf16.mxu1 %v3213_v12  ;;  %v1637_v12 = vrot.slane %v1624_v47, %v1636_v8 }
 0x5d8   :  { %2295 = vmatpush1.bf16.msra.mxu1 %v3211_v14  ;;  %v1641_v14 = vrot.slane %v1624_v47, %v1640_v9 }
 0x5d9   :  { %2296 = vmatprep.subr.bf16.mxu1 %v3216_v15 }
 0x5dc   :  { %2297 = vmatpush1.bf16.msra.mxu1 %v3214_v16 }
 0x5dd   :  { %2298 = vmatprep.subr.bf16.mxu1 %v3219_v17 }
 0x5e0   :  { %2299 = vmatpush1.bf16.msra.mxu1 %v3217_v18 }
 0x5e1   :  { %2300 = vmatprep.subr.bf16.mxu1 %v3222_v19 }
 0x5e4   :  { %2301 = vmatpush1.bf16.msra.mxu1 %v3220_v20 }
 0x5e5   :  { %2302 = vmatprep.subr.bf16.mxu1 %v3225_v53 }
 0x5e8   :  { %2303 = vmatpush1.bf16.msra.mxu1 %v3223_v21 }
 0x5e9   :  { %2304 = vmatprep.subr.bf16.mxu1 %v3228_v22 }
 0x5ec   :  { %2305 = vmatpush1.bf16.msra.mxu1 %v3226_v23 }
 0x5ed   :  { %2306 = vmatprep.subr.bf16.mxu1 %v3231_v24  ;;  %v1652_v24 = vsub.s32 6, %v3749_v10 }
 0x5f0   :  { %2307 = vmatpush1.bf16.msra.mxu1 %v3229_v25 }
 0x5f1   :  { %2308 = vmatprep.subr.bf16.mxu1 %v3234_v26  ;;  %v1653_v26 = vrot.slane %v1624_v47, %v1652_v24 }
 0x5f4   :  { %2309 = vmatpush1.bf16.msra.mxu1 %v3232_v27 }
 0x5f5   :  { %2310 = vmatprep.subr.bf16.mxu1 %v3237_v28 }
 0x5f8   :  { %2311 = vmatpush1.bf16.msra.mxu1 %v3235_v29 }
 0x5f9   :  { %2796 = vmatprep.subr.bf16.mxu1 %v3238_v30 }
 0x5fb   :  { %2313 = vmatmul.mubr.bf16.vlgmr.msra.gmra.mrb[20].mxu1 %v4075_v59 }
 0x5fc   :  { %2797 = vmatpush3.bf16.msra.mxu1 %v3239_v31  ;;  %2398 = vmatprep.mubr.bf16.mxu1 %v4077_v60 }
 0x5fd   :  { %2798 = vmatprep.subr.bf16.mxu1 %v3240_v32 }
 0x600   :  { %2799 = vmatpush3.bf16.msra.mxu1 %v3241_v33 }
 0x601   :  { %2800 = vmatprep.subr.bf16.mxu1 %v3242_v34 }
 0x604   :  { %2801 = vmatpush3.bf16.msra.mxu1 %v3243_v35 }
 0x605   :  { %2802 = vmatprep.subr.bf16.mxu1 %v3244_v36 }
 0x608   :  { %2803 = vmatpush3.bf16.msra.mxu1 %v3245_v37 }
 0x609   :  { %2804 = vmatprep.subr.bf16.mxu1 %v3246_v38 }
 0x60c   :  { %2805 = vmatpush3.bf16.msra.mxu1 %v3247_v39 }
 0x60d   :  { %2806 = vmatprep.subr.bf16.mxu1 %v3248_v40 }
 0x610   :  { %2807 = vmatpush3.bf16.msra.mxu1 %v3249_v41 }
 0x611   :  { %2808 = vmatprep.subr.bf16.mxu1 %v3250_v42 }
 0x614   :  { %2809 = vmatpush3.bf16.msra.mxu1 %v3251_v43 }
 0x615   :  { %2810 = vmatprep.subr.bf16.mxu1 %v3252_v44 }
 0x618   :  { %2811 = vmatpush3.bf16.msra.mxu1 %v3253_v45 }
 0x61b   :  { %2399 = vmatmul.mubr.bf16.vlgmr.msra.gmra.mrb[24].mxu1 %v4075_v59 }
 0x68e   :  { %v2271_v54 = vpop.f32.mrb[16].mxu1  ;;  %v2357_v55 = vpop.f32.mrb[4].mxu0 }
 0x68f   :  { %v2272_v56 = vadd.f32 %v2271_v54, %v1629_v49  ;;  %v2358_v57 = vadd.f32 %v2357_v55, %v1645_v50  ;;  %v2273_v58 = vpop.f32.mrb[17].mxu1  ;;  %v2359_v59 = vpop.f32.mrb[5].mxu0 }
 0x690   :  { %v2274_v60 = vadd.f32 %v2273_v58, %v1633_v51  ;;  %v2360_v61 = vadd.f32 %v2359_v59, %v1649_v52  ;;  %v2275_v62 = vpop.f32.mrb[18].mxu1  ;;  %v2361_v63 = vpop.f32.mrb[6].mxu0 }
 0x691   :  { %v2276_v0 = vadd.f32 %v2275_v62, %v1629_v49  ;;  %v2362_v1 = vadd.f32 %v2361_v63, %v1645_v50  ;;  %v2277_v2 = vpop.f32.mrb[19].mxu1  ;;  %v2363_v3 = vpop.f32.mrb[7].mxu0 }
 0x692   :  { %v2754_v4 = vpack.c.bf16 %v2274_v60, %v2272_v56  ;;  %v2756_v11 = vpack.c.bf16 %v2360_v61, %v2358_v57  ;;  %v2278_v5 = vadd.f32 %v2277_v2, %v1633_v51  ;;  %v2364_v6 = vadd.f32 %v2363_v3, %v1649_v52 }
 0x694   :  { %2451 = vst [vmem:[%s4277_s14] sm:$0xff] %v2754_v4  ;;  %2453 = vst [vmem:[%s4277_s14 + $0x10] sm:$0xff] %v2756_v11  ;;  %v2758_v13 = vpack.c.bf16 %v2278_v5, %v2276_v0  ;;  %v2760_v7 = vpack.c.bf16 %v2364_v6, %v2362_v1 }
 0x696   :  { %2455 = vst [vmem:[%s4277_s14 + $0x1c] sm:$0xff] %v2758_v13  ;;  %2457 = vst [vmem:[%s4277_s14 + $0x2c] sm:$0xff] %v2760_v7 }
 0x6ce   :  { %v2314_v15 = vpop.f32.mrb[20].mxu1 }
 0x6cf   :  { %v2315_v16 = vadd.f32 %v2314_v15, %v1637_v12  ;;  %v2316_v17 = vpop.f32.mrb[21].mxu1 }
 0x6d0   :  { %v2317_v18 = vadd.f32 %v2316_v17, %v1641_v14  ;;  %v2318_v19 = vpop.f32.mrb[22].mxu1 }
 0x6d1   :  { %v2319_v20 = vadd.f32 %v2318_v19, %v1637_v12  ;;  %v2320_v53 = vpop.f32.mrb[23].mxu1 }
 0x6d2   :  { %v2755_v21 = vpack.c.bf16 %v2317_v18, %v2315_v16  ;;  %v2321_v22 = vadd.f32 %v2320_v53, %v1641_v14 }
 0x6d4   :  { %2452 = vst [vmem:[%s4277_s14 + $0x8] sm:$0xff] %v2755_v21  ;;  %v2759_v23 = vpack.c.bf16 %v2321_v22, %v2319_v20 }
 0x6d6   :  { %2456 = vst [vmem:[%s4277_s14 + $0x24] sm:$0xff] %v2759_v23 }
 0x6ee   :  { %v2812_v25 = vpop.f32.mrb[24].mxu1 }
 0x6ef   :  { %v2813_v27 = vpop.f32.mrb[25].mxu1 }
 0x6f0   :  { %v2814_v28 = vadd.f32 %v2813_v27, %v2812_v25  ;;  %v2815_v29 = vpop.f32.mrb[26].mxu1 }
 0x6f1   :  { %v2816_v30 = vpop.f32.mrb[27].mxu1 }
 0x6f2   :  { %v2401_v31 = vadd.f32 %v2814_v28, %v1653_v26  ;;  %v2817_v32 = vadd.f32 %v2816_v30, %v2815_v29 }
 0x6f4   :  { %v2757_v33 = vpack.c.bf16 %v2401_v31, %v2401_v31  ;;  %v2404_v34 = vadd.f32 %v2817_v32, %v1653_v26 }
 0x6f6   :  { %2454 = vst [vmem:[%s4277_s14 + $0x18] sm:$0xf] %v2757_v33  ;;  %v2761_v35 = vpack.c.bf16 %v2404_v34, %v2404_v34 }
 0x6f8   :  { %2458 = vst [vmem:[%s4277_s14 + $0x34] sm:$0xf] %v2761_v35 }

</bundles_post_ra>
